<compile_context>
chip_gen: v6e
topology: v6e:2x2x1
jax: 0.10.0
libtpu: 0.0.40
codegen_flags: <defaults>
</compile_context>

<pallas_src>
import functools

import numpy as np

import jax
import jax.numpy as jnp
from jax import lax
from jax.experimental import pallas as pl
from jax.experimental.pallas import tpu as pltpu

EPSILON = 1e-16
COS_EPS = 1e-8            # torch.nn.functional.cosine_similarity default eps (per-norm clamp)
VMEM_BUDGET = 20 * 1024 * 1024   # conservative per-step budget, safe on v5e/v6e/v7x


def _round_up(x, m):
    return ((x + m - 1) // m) * m


def _pick_batch_tile(b_pad, cap, prefer_split=True):
    """Largest multiple of 8 that divides b_pad, <= cap; split >=2 ways when possible
    so the 'parallel' grid axis can shard across v7x's two TensorCores."""
    limit = max(8, min(cap, b_pad))
    if prefer_split and b_pad >= 16:
        limit = min(limit, max(8, (b_pad // 2) // 8 * 8))
    best = 8
    for d in range(8, b_pad + 1, 8):
        if b_pad % d == 0 and d <= limit:
            best = d
    return best


# --------------------------------------------------------------------------
# Fused TextCNN encoder kernel: im2col conv + bias + ReLU + max-pool-over-time
# for ALL filter sizes (and optionally several encoders) in one pallas_call.
# --------------------------------------------------------------------------
def _conv_pool_kernel(k_max, L, x_ref, w_ref, b_ref, m_ref, o_ref):
    # x_ref: [BT, L + k_max - 1, E]  bf16 (sequence zero-padded at the end)
    # w_ref: [k_max * E, F_pad]      bf16 (tap-major, E-minor rows)
    # b_ref: [1, F_pad]              f32
    # m_ref: [L, F_pad]              f32 validity mask (1 = valid conv position)
    # o_ref: [BT, F_pad]             f32
    x = x_ref[...]
    BT = x.shape[0]
    E = x.shape[2]
    # im2col: concat the k_max shifted views along the lane axis -> ONE deep matmul.
    xcat = jnp.concatenate([x[:, s:s + L, :] for s in range(k_max)], axis=-1)
    xcat = xcat.reshape(BT * L, k_max * E)
    acc = jnp.dot(xcat, w_ref[...], preferred_element_type=jnp.float32)
    F_pad = acc.shape[-1]
    acc = acc.reshape(BT, L, F_pad)
    # bias + ReLU, then zero out-of-range conv positions (ReLU >= 0 so 0 is neutral
    # for the max) using the precomputed mask; single full-tile store.
    acc = jnp.maximum(acc + b_ref[...].reshape(1, 1, F_pad), 0.0) * m_ref[...].reshape(1, L, F_pad)
    o_ref[...] = jnp.max(acc, axis=1)


def cnn_encoder_apply(x_emb, conv, cmeta):
    """Fused TextCNN encoders. x_emb: [B, S, E] (bf16) -> [B, F_tot] f32."""
    B, S, E = x_emb.shape
    k_max, F_tot, F_pad = cmeta['k_max'], cmeta['F_tot'], cmeta['F_pad']
    L = S
    S_pad = S + k_max - 1
    B8 = _round_up(B, 8)

    # VMEM budget per batch row: im2col (bf16) + f32 accumulator + 2x-buffered
    # input tile (bf16) + 2x-buffered output tile (f32).
    per_row = (L * (k_max * E * 2 + F_pad * 4) + 2 * S_pad * E * 2 + 2 * F_pad * 4)
    cap = max(8, (VMEM_BUDGET // per_row) // 8 * 8)
    BT = _pick_batch_tile(B8, cap)

    x_pad = jnp.pad(x_emb, ((0, B8 - B), (0, k_max - 1), (0, 0)))

    out = pl.pallas_call(
        functools.partial(_conv_pool_kernel, k_max, L),
        out_shape=jax.ShapeDtypeStruct((B8, F_pad), jnp.float32),
        grid=(B8 // BT,),
        in_specs=[
            pl.BlockSpec((BT, S_pad, E), lambda i: (i, 0, 0)),
            pl.BlockSpec((k_max * E, F_pad), lambda i: (0, 0)),
            pl.BlockSpec((1, F_pad), lambda i: (0, 0)),
            pl.BlockSpec((L, F_pad), lambda i: (0, 0)),
        ],
        out_specs=pl.BlockSpec((BT, F_pad), lambda i: (i, 0)),
        compiler_params=pltpu.CompilerParams(
            dimension_semantics=("parallel",),
            vmem_limit_bytes=32 * 1024 * 1024),
    )(x_pad, conv['w'], conv['b'], conv['mask'])
    return out[:B, :F_tot]


# --------------------------------------------------------------------------
# Fused MLP heads: pred(relu(m(x))) for charge / article / time; one pallas_call,
# grid parallel over heads, lane-dense (128-padded) logits output.
# --------------------------------------------------------------------------
def _mlp_head_kernel(x_ref, w1_ref, b1_ref, w2_ref, b2_ref, o_ref):
    x = x_ref[...]                                                    # [B8, D] bf16
    h = jnp.dot(x, w1_ref[0], preferred_element_type=jnp.float32) + b1_ref[0]
    h = jnp.maximum(h, 0.0).astype(jnp.bfloat16)
    o_ref[0] = jnp.dot(h, w2_ref[0], preferred_element_type=jnp.float32) + b2_ref[0]


def mlp_heads_apply(x, heads, hmeta):
    """heads: stacked bf16/f32 weights. Returns list of [B, C_i] logits (f32)."""
    B, D = x.shape
    Cs, C_pad, H = hmeta['Cs'], hmeta['C_pad'], hmeta['hidden']
    nh = len(Cs)
    B8 = _round_up(B, 8)
    x_pad = jnp.pad(x, ((0, B8 - B), (0, 0))).astype(jnp.bfloat16)

    out = pl.pallas_call(
        _mlp_head_kernel,
        out_shape=jax.ShapeDtypeStruct((nh, B8, C_pad), jnp.float32),
        grid=(nh,),
        in_specs=[pl.BlockSpec((B8, D), lambda i: (0, 0)),
                  pl.BlockSpec((1, D, H), lambda i: (i, 0, 0)),
                  pl.BlockSpec((1, 1, H), lambda i: (i, 0, 0)),
                  pl.BlockSpec((1, H, C_pad), lambda i: (i, 0, 0)),
                  pl.BlockSpec((1, 1, C_pad), lambda i: (i, 0, 0))],
        out_specs=pl.BlockSpec((1, B8, C_pad), lambda i: (i, 0, 0)),
        compiler_params=pltpu.CompilerParams(dimension_semantics=("parallel",)),
    )(x_pad, heads['w1'], heads['b1'], heads['w2'], heads['b2'])
    return [out[i, :B, :c] for i, c in enumerate(Cs)]


# --------------------------------------------------------------------------
# Fused cosine similarities: [B,B] matrix of `a` with itself + pairwise
# cosine(a[b], b[b, m]) for all pos/neg samples, row-tiled parallel grid.
# --------------------------------------------------------------------------
def _cosine_kernel(a_ref, af_ref, b_ref, mat_ref, pair_ref):
    a = a_ref[...].astype(jnp.float32)                                # [BT, D]  row tile
    af = af_ref[...].astype(jnp.float32)                              # [B8, D]  full batch
    b = b_ref[...].astype(jnp.float32)                                # [BT, M, D]
    eps2 = COS_EPS * COS_EPS
    # torch clamp: x / max(||x||, eps)  ==  x * rsqrt(max(||x||^2, eps^2))  (EUP rsqrt)
    a_n = a * lax.rsqrt(jnp.maximum(jnp.sum(a * a, axis=-1, keepdims=True), eps2))
    af_n = af * lax.rsqrt(jnp.maximum(jnp.sum(af * af, axis=-1, keepdims=True), eps2))
    mat_ref[...] = lax.dot_general(a_n, af_n, (((1,), (1,)), ((), ())),
                                   preferred_element_type=jnp.float32)
    inv_bn = lax.rsqrt(jnp.maximum(jnp.sum(b * b, axis=-1), eps2))    # [BT, M]
    # broadcast-multiply + lane reduce (no q=1 batched MXU matmuls)
    pair_ref[...] = jnp.sum(a_n[:, None, :] * b, axis=-1) * inv_bn


def cosine_matrix_and_pairs(a, b):
    B, D = a.shape
    M = b.shape[1]
    B8 = _round_up(B, 8)
    a_pad = jnp.pad(a, ((0, B8 - B), (0, 0)))
    b_pad = jnp.pad(b, ((0, B8 - B), (0, 0), (0, 0)))
    BT = _pick_batch_tile(B8, cap=64)
    mat, pairs = pl.pallas_call(
        _cosine_kernel,
        out_shape=(jax.ShapeDtypeStruct((B8, B8), jnp.float32),
                   jax.ShapeDtypeStruct((B8, M), jnp.float32)),
        grid=(B8 // BT,),
        in_specs=[pl.BlockSpec((BT, D), lambda i: (i, 0)),
                  pl.BlockSpec((B8, D), lambda i: (0, 0)),
                  pl.BlockSpec((BT, M, D), lambda i: (i, 0, 0))],
        out_specs=(pl.BlockSpec((BT, B8), lambda i: (i, 0)),
                   pl.BlockSpec((BT, M), lambda i: (i, 0))),
        compiler_params=pltpu.CompilerParams(dimension_semantics=("parallel",)),
    )(a_pad, a_pad, b_pad)
    return mat[:B, :B], pairs[:B]


# --------------------------------------------------------------------------
# Plain-JAX glue (losses, dropout, embedding gather)
# --------------------------------------------------------------------------
def cross_entropy(logits, labels):
    logp = jax.nn.log_softmax(logits, axis=-1)
    picked = jnp.take_along_axis(logp, labels[:, None], axis=-1)[:, 0]
    return -jnp.mean(picked)


def dropout(x, key, p=0.5):
    keep = jax.random.bernoulli(key, 1.0 - p, x.shape)
    return jnp.where(keep, x / (1.0 - p), 0.0)


def contrastive_loss(positive_matrix, negative_matrix, masks, temperature):
    positive = jnp.sum(jnp.exp(positive_matrix * temperature), axis=-1)
    negative = jnp.sum(jnp.exp(negative_matrix * temperature), axis=-1)
    loss = -jnp.log(positive / (positive + negative + EPSILON))
    loss = loss * masks
    msum = masks.sum()
    return jnp.where(msum == 0.0, 0.0, loss.sum() / jnp.maximum(msum, 1e-30))


def contrastive_loss_mini_batch(cos_matrix, one_hot_labels, temperature):
    """cos_matrix: precomputed [B,B] feature cosine (reused by both callers)."""
    B = cos_matrix.shape[0]
    eye = jnp.eye(B, dtype=jnp.float32)
    sim = temperature * (cos_matrix * 0.5 + 0.5)
    # one-hot rows have unit norm, so their cosine matrix is just the dot product
    mask_positive = jnp.dot(one_hot_labels, one_hot_labels.T) - eye
    law_mask = (mask_positive.sum(axis=-1) != 0.0).astype(jnp.float32)
    mask_all = 1.0 - eye
    e = jnp.exp(sim)
    num = (e * mask_positive).sum(axis=-1) + EPSILON
    den = (e * mask_all).sum(axis=-1)
    loss = -jnp.log(num / den) * law_mask
    s = law_mask.sum()
    return jnp.where(s == 0.0, 0.0, loss.sum() / jnp.maximum(s, 1e-30))


# --------------------------------------------------------------------------
# Parameter preparation (hoisted out of the jitted step; runs once on host)
# --------------------------------------------------------------------------
def _fuse_conv(enc_param_list, S):
    """Pad taps to k_max, concat all encoders' filters along the feature axis (lane-
    padded to a multiple of 128), reshape to im2col layout, precompute validity mask."""
    k_max = max(np.asarray(w).shape[0] for enc in enc_param_list for (w, _) in enc)
    ws, bs, groups = [], [], []
    col = 0
    for enc in enc_param_list:
        for (w, b) in enc:
            w = np.asarray(w, np.float32)
            k, E, F = w.shape
            wp = np.zeros((k_max, E, F), np.float32)
            wp[:k] = w
            ws.append(wp)
            bs.append(np.asarray(b, np.float32))
            groups.append((col, col + F, k))
            col += F
    F_tot = col
    F_pad = _round_up(F_tot, 128)
    W = np.concatenate(ws, axis=-1)                                    # [k_max, E, F_tot]
    W = np.pad(W, ((0, 0), (0, 0), (0, F_pad - F_tot)))
    b_all = np.pad(np.concatenate(bs, axis=-1), ((0, 0), (0, F_pad - F_tot)))
    E = W.shape[1]
    W2d = W.reshape(k_max * E, F_pad)                                  # tap-major, E-minor

    # Validity mask: conv position r valid for a filter of size k iff r <= S - k.
    mask = np.zeros((S, F_pad), np.float32)
    for (start, end, k) in groups:
        mask[: S - k + 1, start:end] = 1.0

    conv = {'w': jnp.asarray(W2d, jnp.bfloat16),
            'b': jnp.asarray(b_all, jnp.float32),
            'mask': jnp.asarray(mask, jnp.float32)}
    cmeta = {'k_max': int(k_max), 'F_tot': int(F_tot), 'F_pad': int(F_pad)}
    return conv, cmeta


def _prep_heads(heads):
    """heads: list of (w1 [D,H], b1 [1,H], w2 [H,C], b2 [1,C]) -> stacked, lane-padded."""
    H = np.asarray(heads[0][0]).shape[1]
    Cs = [np.asarray(h[2]).shape[1] for h in heads]
    C_pad = _round_up(max(Cs), 128)
    w1 = np.stack([np.asarray(h[0], np.float32) for h in heads])           # [nh, D, H]
    b1 = np.stack([np.asarray(h[1], np.float32) for h in heads])           # [nh, 1, H]
    w2 = np.stack([np.pad(np.asarray(h[2], np.float32), ((0, 0), (0, C_pad - c)))
                   for h, c in zip(heads, Cs)])                            # [nh, H, C_pad]
    b2 = np.stack([np.pad(np.asarray(h[3], np.float32), ((0, 0), (0, C_pad - c)))
                   for h, c in zip(heads, Cs)])                            # [nh, 1, C_pad]
    arrays = {'w1': jnp.asarray(w1, jnp.bfloat16), 'b1': jnp.asarray(b1, jnp.float32),
              'w2': jnp.asarray(w2, jnp.bfloat16), 'b2': jnp.asarray(b2, jnp.float32)}
    hmeta = {'Cs': tuple(int(c) for c in Cs), 'C_pad': int(C_pad), 'hidden': int(H)}
    return arrays, hmeta


def prepare_params(params, S):
    conv_fact, meta_fact = _fuse_conv([params['general_enc'], params['contrastive_enc']], S)
    conv_other, meta_other = _fuse_conv([params['contrastive_enc']], S)
    heads_arr, heads_meta = _prep_heads(
        [params['charge_head'], params['article_head'], params['time_head']])
    prep = {
        # TODO(synk): bf16 embedding/weights (f32 accumulation) -> small numeric drift
        # vs the torch f32 reference; document the tolerance.
        'embedding': jnp.asarray(params['embedding'], jnp.bfloat16),
        'conv_fact': conv_fact, 'conv_other': conv_other, 'heads': heads_arr,
        'one_hot_law': params['one_hot_law'], 'one_hot_charge': params['one_hot_charge'],
        'article_scalar': params['article_scalar'], 'charge_scalar': params['charge_scalar'],
        'AL_scalar': params['AL_scalar'], 'CL_scalar': params['CL_scalar'],
    }
    feat_len = sum(np.asarray(w).shape[-1] for (w, _) in params['general_enc'])
    meta = {'conv_fact': meta_fact, 'conv_other': meta_other, 'heads': heads_meta,
            'feat_len': int(feat_len)}
    return prep, meta


# --------------------------------------------------------------------------
# Full forward (train mode), mirroring CL4LJP.forward
# --------------------------------------------------------------------------
def cl4ljp_forward(prep, fact, article_list, charge_label, article_label,
                   time_label, article_pos, article_neg, charge_pos, charge_neg,
                   article_neg_masks, charge_neg_masks, dropout_key, *, meta):
    emb = prep['embedding']
    B, N = article_neg.shape
    charge_neg_flat = charge_neg.reshape(B * N, -1)
    article_neg_flat = article_neg.reshape(B * N)
    feat_len = meta['feat_len']

    # --- fact branch: general + contrastive encoders fused into one conv call ---
    fact_embedding = jnp.take(emb, fact, axis=0)                      # [B, S, E] bf16
    fact_feats = cnn_encoder_apply(fact_embedding, prep['conv_fact'], meta['conv_fact'])
    fact_general = fact_feats[:, :feat_len]
    fact_contrastive = fact_feats[:, feat_len:]

    keys = jax.random.split(dropout_key, 5)
    # TODO(synk): dropout uses JAX PRNG (not torch's RNG stream); semantics
    # (inverted dropout, p=0.5, train mode) match, exact masks differ.
    fact_general = dropout(fact_general, keys[0])
    fact_contrastive = dropout(fact_contrastive, keys[1])
    fact_rep = jnp.concatenate([fact_general, fact_contrastive], axis=-1)

    charge_pred, article_pred, time_pred = mlp_heads_apply(
        fact_rep, prep['heads'], meta['heads'])

    # --- contrastive encoder over charge_pos / charge_neg / articles in ONE call ---
    other_tokens = jnp.concatenate([charge_pos, charge_neg_flat, article_list], axis=0)
    other_embedding = jnp.take(emb, other_tokens, axis=0)
    other_feats = cnn_encoder_apply(other_embedding, prep['conv_other'], meta['conv_other'])
    charges_pos = other_feats[:B]
    charges_neg = other_feats[B:B + B * N].reshape(B, N, -1)
    articles = other_feats[B + B * N:]

    charges_pos = dropout(charges_pos, keys[2])
    charges_neg = dropout(charges_neg, keys[3])
    articles = dropout(articles, keys[4])
    articles_pos = jnp.take(articles, article_pos, axis=0)
    articles_neg = jnp.take(articles, article_neg_flat, axis=0).reshape(B, N, -1)

    # --- all cosine similarities (feature matrix + pos/neg pairs) in ONE call ---
    pair_feats = jnp.concatenate(
        [charges_pos[:, None, :], charges_neg,
         articles_pos[:, None, :], articles_neg], axis=1)             # [B, 2N+2, D]
    feat_cos, pair_cos = cosine_matrix_and_pairs(fact_contrastive, pair_feats)
    pair_sims = pair_cos * 0.5 + 0.5
    charge_pos_similarity = pair_sims[:, 0:1]
    charge_neg_similarity = pair_sims[:, 1:1 + N]
    article_pos_similarity = pair_sims[:, 1 + N:2 + N]
    article_neg_similarity = pair_sims[:, 2 + N:]

    charge_loss = cross_entropy(charge_pred, charge_label)
    article_loss = cross_entropy(article_pred, article_label)
    time_loss = cross_entropy(time_pred, time_label)

    law_label_OH = jnp.take(prep['one_hot_law'], article_label, axis=0)
    charge_label_OH = jnp.take(prep['one_hot_charge'], charge_label, axis=0)

    label_AL = contrastive_loss_mini_batch(feat_cos, law_label_OH, prep['AL_scalar'])
    label_CL = contrastive_loss_mini_batch(feat_cos, charge_label_OH, prep['CL_scalar'])
    article_CL = contrastive_loss(article_pos_similarity, article_neg_similarity,
                                  article_neg_masks, prep['article_scalar'])
    charge_CL = contrastive_loss(charge_pos_similarity, charge_neg_similarity,
                                 charge_neg_masks, prep['charge_scalar'])

    return {'charge_loss': charge_loss, 'article_loss': article_loss,
            'time_loss': time_loss, 'article_CL': article_CL,
            'charge_CL': charge_CL, 'label_AL': label_AL, 'label_CL': label_CL}


# --------------------------------------------------------------------------
# Deterministic parameter init
# --------------------------------------------------------------------------
def init_cnn_params(key, E, filter_sizes, filter_num):
    params = []
    for k_sz in filter_sizes:
        key, kw, kb = jax.random.split(key, 3)
        w = jax.random.normal(kw, (k_sz, E, filter_num), jnp.float32) * 0.1
        b = jax.random.normal(kb, (1, filter_num), jnp.float32) * 0.01
        params.append((w, b))
    return params


def init_params(key, vocab, E, hidden, law_num, accu_num, time_num,
                filter_sizes, filter_num):
    ks = jax.random.split(key, 10)
    feature_len = filter_num * len(filter_sizes)

    def lin(k, din, dout):
        k1, k2 = jax.random.split(k)
        return (jax.random.normal(k1, (din, dout), jnp.float32) * 0.1,
                jax.random.normal(k2, (1, dout), jnp.float32) * 0.01)

    p = {}
    p['embedding'] = jax.random.normal(ks[0], (vocab, E), jnp.float32) * 0.1
    p['general_enc'] = init_cnn_params(ks[1], E, filter_sizes, filter_num)
    p['contrastive_enc'] = init_cnn_params(ks[2], E, filter_sizes, filter_num)
    cw, cb = lin(ks[3], 2 * feature_len, hidden)
    cpw, cpb = lin(ks[4], hidden, accu_num)
    p['charge_head'] = (cw, cb, cpw, cpb)
    aw, ab = lin(ks[5], 2 * feature_len, hidden)
    apw, apb = lin(ks[6], hidden, law_num)
    p['article_head'] = (aw, ab, apw, apb)
    tw, tb = lin(ks[7], 2 * feature_len, hidden)
    tpw, tpb = lin(ks[8], hidden, time_num)
    p['time_head'] = (tw, tb, tpw, tpb)
    p['one_hot_law'] = jnp.eye(law_num, dtype=jnp.float32)
    p['one_hot_charge'] = jnp.eye(accu_num, dtype=jnp.float32)
    p['article_scalar'] = jnp.float32(2.0)
    p['charge_scalar'] = jnp.float32(2.0)
    p['AL_scalar'] = jnp.float32(2.0)
    p['CL_scalar'] = jnp.float32(2.0)
    return p


# --------------------------------------------------------------------------
if __name__ == "__main__":
    key = jax.random.PRNGKey(0)
    vocab, E, S = 100, 32, 16
    B, N = 4, 2
    hidden = 32
    law_num, accu_num, time_num = 6, 7, 5
    article_num = law_num
    filter_sizes = (2, 3, 4, 5)      # 4 sizes x 32 filters -> 128-lane-dense features
    filter_num = 32

    pkey, dkey, ikey = jax.random.split(key, 3)
    params = init_params(pkey, vocab, E, hidden, law_num, accu_num, time_num,
                         filter_sizes, filter_num)
    prep, meta = prepare_params(params, S)     # weight fusion hoisted out of the jit

    iks = jax.random.split(ikey, 9)
    fact = jax.random.randint(iks[0], (B, S), 0, vocab)
    article_list = jax.random.randint(iks[1], (article_num, S), 0, vocab)
    charge_label = jax.random.randint(iks[2], (B,), 0, accu_num)
    article_label = jax.random.randint(iks[3], (B,), 0, law_num)
    time_label = jax.random.randint(iks[4], (B,), 0, time_num)
    article_pos = jax.random.randint(iks[5], (B,), 0, article_num)
    article_neg = jax.random.randint(iks[6], (B, N), 0, article_num)
    charge_pos = jax.random.randint(iks[7], (B, S), 0, vocab)
    charge_neg = jax.random.randint(iks[8], (B, N, S), 0, vocab)
    article_neg_masks = jnp.array([1.0, 1.0, 0.0, 1.0], jnp.float32)
    charge_neg_masks = jnp.array([1.0, 0.0, 1.0, 1.0], jnp.float32)

    fwd = jax.jit(functools.partial(cl4ljp_forward, meta=meta))
    out = fwd(prep, fact, article_list, charge_label, article_label,
              time_label, article_pos, article_neg, charge_pos, charge_neg,
              article_neg_masks, charge_neg_masks, dkey)
    out = jax.tree_util.tree_map(jax.block_until_ready, out)
    print("KERNEL_OK")
</pallas_src>

<mosaic_0001>
module attributes {stable_mosaic.version = 11 : i64} {
  func.func @_conv_pool_kernel(%arg0: i32, %arg1: memref<8x20x32xbf16, #tpu.memory_space<vmem>>, %arg2: memref<160x256xbf16, #tpu.memory_space<vmem>>, %arg3: memref<1x256xf32, #tpu.memory_space<vmem>>, %arg4: memref<16x256xf32, #tpu.memory_space<vmem>>, %arg5: memref<8x256xf32, #tpu.memory_space<vmem>>) attributes {dimension_semantics = [#tpu.dimension_semantics<parallel>], iteration_bounds = array<i64: 1>, scalar_prefetch = 0 : i64, scratch_operands = 0 : i64, tpu.core_type = #tpu.core_type<tc>, window_params = [{transform_indices = @transform_0, window_bounds = array<i64: 8, 20, 32>}, {pipeline_mode = #tpu.pipeline_mode<synchronous>, transform_indices = @transform_1, window_bounds = array<i64: 160, 256>}, {pipeline_mode = #tpu.pipeline_mode<synchronous>, transform_indices = @transform_2, window_bounds = array<i64: 1, 256>}, {pipeline_mode = #tpu.pipeline_mode<synchronous>, transform_indices = @transform_3, window_bounds = array<i64: 16, 256>}, {transform_indices = @transform_4, window_bounds = array<i64: 8, 256>}]} {
    %c0 = arith.constant 0 : index
    %c0_0 = arith.constant 0 : index
    %c0_1 = arith.constant 0 : index
    %0 = vector.load %arg1[%c0, %c0_0, %c0_1] : memref<8x20x32xbf16, #tpu.memory_space<vmem>>, vector<8x20x32xbf16>
    %1 = vector.extract_strided_slice %0 {offsets = [0, 0, 0], sizes = [8, 16, 32], strides = [1, 1, 1]} : vector<8x20x32xbf16> to vector<8x16x32xbf16>
    %2 = vector.extract_strided_slice %0 {offsets = [0, 1, 0], sizes = [8, 16, 32], strides = [1, 1, 1]} : vector<8x20x32xbf16> to vector<8x16x32xbf16>
    %3 = vector.extract_strided_slice %0 {offsets = [0, 2, 0], sizes = [8, 16, 32], strides = [1, 1, 1]} : vector<8x20x32xbf16> to vector<8x16x32xbf16>
    %4 = vector.extract_strided_slice %0 {offsets = [0, 3, 0], sizes = [8, 16, 32], strides = [1, 1, 1]} : vector<8x20x32xbf16> to vector<8x16x32xbf16>
    %5 = vector.extract_strided_slice %0 {offsets = [0, 4, 0], sizes = [8, 16, 32], strides = [1, 1, 1]} : vector<8x20x32xbf16> to vector<8x16x32xbf16>
    %6 = tpu.concatenate %1, %2, %3, %4, %5 in 2 : vector<8x16x32xbf16>, vector<8x16x32xbf16>, vector<8x16x32xbf16>, vector<8x16x32xbf16>, vector<8x16x32xbf16> -> vector<8x16x160xbf16>
    %7 = vector.shape_cast %6 : vector<8x16x160xbf16> to vector<128x160xbf16>
    %c0_2 = arith.constant 0 : index
    %c0_3 = arith.constant 0 : index
    %8 = vector.load %arg2[%c0_2, %c0_3] : memref<160x256xbf16, #tpu.memory_space<vmem>>, vector<160x256xbf16>
    %cst = arith.constant dense<0.000000e+00> : vector<128x256xf32>
    %9 = tpu.matmul %7, %8, %cst {dimension_numbers = #tpu.dot_dimension_numbers<[1], [0], [0], [1], [0, 0, 1, 1], [], []>} : vector<128x160xbf16>, vector<160x256xbf16>, vector<128x256xf32> -> vector<128x256xf32>
    %10 = vector.shape_cast %9 : vector<128x256xf32> to vector<8x16x256xf32>
    %c0_4 = arith.constant 0 : index
    %c0_5 = arith.constant 0 : index
    %11 = vector.load %arg3[%c0_4, %c0_5] : memref<1x256xf32, #tpu.memory_space<vmem>>, vector<1x256xf32>
    %12 = vector.shape_cast %11 : vector<1x256xf32> to vector<1x1x256xf32>
    %13 = vector.broadcast %12 : vector<1x1x256xf32> to vector<8x16x256xf32>
    %14 = arith.addf %10, %13 : vector<8x16x256xf32>
    %cst_6 = arith.constant 0.000000e+00 : f32
    %15 = vector.broadcast %cst_6 : f32 to vector<8x16x256xf32>
    %16 = arith.maximumf %14, %15 : vector<8x16x256xf32>
    %c0_7 = arith.constant 0 : index
    %c0_8 = arith.constant 0 : index
    %17 = vector.load %arg4[%c0_7, %c0_8] : memref<16x256xf32, #tpu.memory_space<vmem>>, vector<16x256xf32>
    %18 = vector.shape_cast %17 : vector<16x256xf32> to vector<1x16x256xf32>
    %19 = vector.broadcast %18 : vector<1x16x256xf32> to vector<8x16x256xf32>
    %20 = arith.mulf %16, %19 : vector<8x16x256xf32>
    %cst_9 = arith.constant dense<0xFF800000> : vector<8x256xf32>
    %21 = vector.multi_reduction <maximumf>, %20, %cst_9 [1] : vector<8x16x256xf32> to vector<8x256xf32>
    %c0_10 = arith.constant 0 : index
    %c0_11 = arith.constant 0 : index
    %22 = vector.load %arg5[%c0_10, %c0_11] : memref<8x256xf32, #tpu.memory_space<vmem>>, vector<8x256xf32>
    tpu.vector_store %arg5[%c0_10, %c0_11], %21 {strides = array<i32>} : memref<8x256xf32, #tpu.memory_space<vmem>>, vector<8x256xf32>,
    return
  }
  func.func @transform_0(%arg0: i32) -> (i32, i32, i32) {
    %c0_i32 = arith.constant 0 : i32
    %c0_i32_0 = arith.constant 0 : i32
    %c0_i32_1 = arith.constant 0 : i32
    return %arg0, %c0_i32, %c0_i32_0 : i32, i32, i32
  }
  func.func @transform_1(%arg0: i32) -> (i32, i32) {
    %c0_i32 = arith.constant 0 : i32
    %c0_i32_0 = arith.constant 0 : i32
    %c0_i32_1 = arith.constant 0 : i32
    return %c0_i32, %c0_i32_0 : i32, i32
  }
  func.func @transform_2(%arg0: i32) -> (i32, i32) {
    %c0_i32 = arith.constant 0 : i32
    %c0_i32_0 = arith.constant 0 : i32
    %c0_i32_1 = arith.constant 0 : i32
    return %c0_i32, %c0_i32_0 : i32, i32
  }
  func.func @transform_3(%arg0: i32) -> (i32, i32) {
    %c0_i32 = arith.constant 0 : i32
    %c0_i32_0 = arith.constant 0 : i32
    %c0_i32_1 = arith.constant 0 : i32
    return %c0_i32, %c0_i32_0 : i32, i32
  }
  func.func @transform_4(%arg0: i32) -> (i32, i32) {
    %c0_i32 = arith.constant 0 : i32
    %c0_i32_0 = arith.constant 0 : i32
    return %arg0, %c0_i32 : i32, i32
  }
}

module attributes {stable_mosaic.version = 11 : i64} {
  func.func @_conv_pool_kernel(%arg0: i32, %arg1: memref<8x20x32xbf16, #tpu.memory_space<vmem>>, %arg2: memref<160x128xbf16, #tpu.memory_space<vmem>>, %arg3: memref<1x128xf32, #tpu.memory_space<vmem>>, %arg4: memref<16x128xf32, #tpu.memory_space<vmem>>, %arg5: memref<8x128xf32, #tpu.memory_space<vmem>>) attributes {dimension_semantics = [#tpu.dimension_semantics<parallel>], iteration_bounds = array<i64: 3>, scalar_prefetch = 0 : i64, scratch_operands = 0 : i64, tpu.core_type = #tpu.core_type<tc>, window_params = [{transform_indices = @transform_0, window_bounds = array<i64: 8, 20, 32>}, {pipeline_mode = #tpu.pipeline_mode<synchronous>, transform_indices = @transform_1, window_bounds = array<i64: 160, 128>}, {pipeline_mode = #tpu.pipeline_mode<synchronous>, transform_indices = @transform_2, window_bounds = array<i64: 1, 128>}, {pipeline_mode = #tpu.pipeline_mode<synchronous>, transform_indices = @transform_3, window_bounds = array<i64: 16, 128>}, {transform_indices = @transform_4, window_bounds = array<i64: 8, 128>}]} {
    %c0 = arith.constant 0 : index
    %c0_0 = arith.constant 0 : index
    %c0_1 = arith.constant 0 : index
    %0 = vector.load %arg1[%c0, %c0_0, %c0_1] : memref<8x20x32xbf16, #tpu.memory_space<vmem>>, vector<8x20x32xbf16>
    %1 = vector.extract_strided_slice %0 {offsets = [0, 0, 0], sizes = [8, 16, 32], strides = [1, 1, 1]} : vector<8x20x32xbf16> to vector<8x16x32xbf16>
    %2 = vector.extract_strided_slice %0 {offsets = [0, 1, 0], sizes = [8, 16, 32], strides = [1, 1, 1]} : vector<8x20x32xbf16> to vector<8x16x32xbf16>
    %3 = vector.extract_strided_slice %0 {offsets = [0, 2, 0], sizes = [8, 16, 32], strides = [1, 1, 1]} : vector<8x20x32xbf16> to vector<8x16x32xbf16>
    %4 = vector.extract_strided_slice %0 {offsets = [0, 3, 0], sizes = [8, 16, 32], strides = [1, 1, 1]} : vector<8x20x32xbf16> to vector<8x16x32xbf16>
    %5 = vector.extract_strided_slice %0 {offsets = [0, 4, 0], sizes = [8, 16, 32], strides = [1, 1, 1]} : vector<8x20x32xbf16> to vector<8x16x32xbf16>
    %6 = tpu.concatenate %1, %2, %3, %4, %5 in 2 : vector<8x16x32xbf16>, vector<8x16x32xbf16>, vector<8x16x32xbf16>, vector<8x16x32xbf16>, vector<8x16x32xbf16> -> vector<8x16x160xbf16>
    %7 = vector.shape_cast %6 : vector<8x16x160xbf16> to vector<128x160xbf16>
    %c0_2 = arith.constant 0 : index
    %c0_3 = arith.constant 0 : index
    %8 = vector.load %arg2[%c0_2, %c0_3] : memref<160x128xbf16, #tpu.memory_space<vmem>>, vector<160x128xbf16>
    %cst = arith.constant dense<0.000000e+00> : vector<128x128xf32>
    %9 = tpu.matmul %7, %8, %cst {dimension_numbers = #tpu.dot_dimension_numbers<[1], [0], [0], [1], [0, 0, 1, 1], [], []>} : vector<128x160xbf16>, vector<160x128xbf16>, vector<128x128xf32> -> vector<128x128xf32>
    %10 = vector.shape_cast %9 : vector<128x128xf32> to vector<8x16x128xf32>
    %c0_4 = arith.constant 0 : index
    %c0_5 = arith.constant 0 : index
    %11 = vector.load %arg3[%c0_4, %c0_5] : memref<1x128xf32, #tpu.memory_space<vmem>>, vector<1x128xf32>
    %12 = vector.shape_cast %11 : vector<1x128xf32> to vector<1x1x128xf32>
    %13 = vector.broadcast %12 : vector<1x1x128xf32> to vector<8x16x128xf32>
    %14 = arith.addf %10, %13 : vector<8x16x128xf32>
    %cst_6 = arith.constant 0.000000e+00 : f32
    %15 = vector.broadcast %cst_6 : f32 to vector<8x16x128xf32>
    %16 = arith.maximumf %14, %15 : vector<8x16x128xf32>
    %c0_7 = arith.constant 0 : index
    %c0_8 = arith.constant 0 : index
    %17 = vector.load %arg4[%c0_7, %c0_8] : memref<16x128xf32, #tpu.memory_space<vmem>>, vector<16x128xf32>
    %18 = vector.shape_cast %17 : vector<16x128xf32> to vector<1x16x128xf32>
    %19 = vector.broadcast %18 : vector<1x16x128xf32> to vector<8x16x128xf32>
    %20 = arith.mulf %16, %19 : vector<8x16x128xf32>
    %cst_9 = arith.constant dense<0xFF800000> : vector<8x128xf32>
    %21 = vector.multi_reduction <maximumf>, %20, %cst_9 [1] : vector<8x16x128xf32> to vector<8x128xf32>
    %c0_10 = arith.constant 0 : index
    %c0_11 = arith.constant 0 : index
    %22 = vector.load %arg5[%c0_10, %c0_11] : memref<8x128xf32, #tpu.memory_space<vmem>>, vector<8x128xf32>
    tpu.vector_store %arg5[%c0_10, %c0_11], %21 {strides = array<i32>} : memref<8x128xf32, #tpu.memory_space<vmem>>, vector<8x128xf32>,
    return
  }
  func.func @transform_0(%arg0: i32) -> (i32, i32, i32) {
    %c0_i32 = arith.constant 0 : i32
    %c0_i32_0 = arith.constant 0 : i32
    %c0_i32_1 = arith.constant 0 : i32
    return %arg0, %c0_i32, %c0_i32_0 : i32, i32, i32
  }
  func.func @transform_1(%arg0: i32) -> (i32, i32) {
    %c0_i32 = arith.constant 0 : i32
    %c0_i32_0 = arith.constant 0 : i32
    %c0_i32_1 = arith.constant 0 : i32
    return %c0_i32, %c0_i32_0 : i32, i32
  }
  func.func @transform_2(%arg0: i32) -> (i32, i32) {
    %c0_i32 = arith.constant 0 : i32
    %c0_i32_0 = arith.constant 0 : i32
    %c0_i32_1 = arith.constant 0 : i32
    return %c0_i32, %c0_i32_0 : i32, i32
  }
  func.func @transform_3(%arg0: i32) -> (i32, i32) {
    %c0_i32 = arith.constant 0 : i32
    %c0_i32_0 = arith.constant 0 : i32
    %c0_i32_1 = arith.constant 0 : i32
    return %c0_i32, %c0_i32_0 : i32, i32
  }
  func.func @transform_4(%arg0: i32) -> (i32, i32) {
    %c0_i32 = arith.constant 0 : i32
    %c0_i32_0 = arith.constant 0 : i32
    return %arg0, %c0_i32 : i32, i32
  }
}

module attributes {stable_mosaic.version = 11 : i64} {
  func.func @_cosine_kernel(%arg0: i32, %arg1: memref<8x128xf32, #tpu.memory_space<vmem>>, %arg2: memref<8x128xf32, #tpu.memory_space<vmem>>, %arg3: memref<8x6x128xf32, #tpu.memory_space<vmem>>, %arg4: memref<8x8xf32, #tpu.memory_space<vmem>>, %arg5: memref<8x6xf32, #tpu.memory_space<vmem>>) attributes {dimension_semantics = [#tpu.dimension_semantics<parallel>], iteration_bounds = array<i64: 1>, scalar_prefetch = 0 : i64, scratch_operands = 0 : i64, tpu.core_type = #tpu.core_type<tc>, window_params = [{transform_indices = @transform_0, window_bounds = array<i64: 8, 128>}, {pipeline_mode = #tpu.pipeline_mode<synchronous>, transform_indices = @transform_1, window_bounds = array<i64: 8, 128>}, {transform_indices = @transform_2, window_bounds = array<i64: 8, 6, 128>}, {transform_indices = @transform_3, window_bounds = array<i64: 8, 8>}, {transform_indices = @transform_4, window_bounds = array<i64: 8, 6>}]} {
    %c0 = arith.constant 0 : index
    %c0_0 = arith.constant 0 : index
    %0 = vector.load %arg1[%c0, %c0_0] : memref<8x128xf32, #tpu.memory_space<vmem>>, vector<8x128xf32>
    %c0_1 = arith.constant 0 : index
    %c0_2 = arith.constant 0 : index
    %1 = vector.load %arg2[%c0_1, %c0_2] : memref<8x128xf32, #tpu.memory_space<vmem>>, vector<8x128xf32>
    %c0_3 = arith.constant 0 : index
    %c0_4 = arith.constant 0 : index
    %c0_5 = arith.constant 0 : index
    %2 = vector.load %arg3[%c0_3, %c0_4, %c0_5] : memref<8x6x128xf32, #tpu.memory_space<vmem>>, vector<8x6x128xf32>
    %3 = arith.mulf %0, %0 : vector<8x128xf32>
    %cst = arith.constant dense<0.000000e+00> : vector<8xf32>
    %4 = vector.multi_reduction <add>, %3, %cst [1] : vector<8x128xf32> to vector<8xf32>
    %5 = vector.shape_cast %4 : vector<8xf32> to vector<8x1xf32>
    %cst_6 = arith.constant 1.000000e-16 : f32
    %6 = vector.broadcast %cst_6 : f32 to vector<8x1xf32>
    %7 = arith.maximumf %5, %6 : vector<8x1xf32>
    %8 = math.rsqrt %7 : vector<8x1xf32>
    %9 = vector.broadcast %8 : vector<8x1xf32> to vector<8x128xf32>
    %10 = arith.mulf %0, %9 : vector<8x128xf32>
    %11 = arith.mulf %1, %1 : vector<8x128xf32>
    %cst_7 = arith.constant dense<0.000000e+00> : vector<8xf32>
    %12 = vector.multi_reduction <add>, %11, %cst_7 [1] : vector<8x128xf32> to vector<8xf32>
    %13 = vector.shape_cast %12 : vector<8xf32> to vector<8x1xf32>
    %cst_8 = arith.constant 1.000000e-16 : f32
    %14 = vector.broadcast %cst_8 : f32 to vector<8x1xf32>
    %15 = arith.maximumf %13, %14 : vector<8x1xf32>
    %16 = math.rsqrt %15 : vector<8x1xf32>
    %17 = vector.broadcast %16 : vector<8x1xf32> to vector<8x128xf32>
    %18 = arith.mulf %1, %17 : vector<8x128xf32>
    %cst_9 = arith.constant dense<0.000000e+00> : vector<8x8xf32>
    %19 = tpu.matmul %10, %18, %cst_9 {dimension_numbers = #tpu.dot_dimension_numbers<[1], [1], [0], [0], [0, 0, 1, 0], [], []>} : vector<8x128xf32>, vector<8x128xf32>, vector<8x8xf32> -> vector<8x8xf32>
    %c0_10 = arith.constant 0 : index
    %c0_11 = arith.constant 0 : index
    %20 = vector.load %arg4[%c0_10, %c0_11] : memref<8x8xf32, #tpu.memory_space<vmem>>, vector<8x8xf32>
    tpu.vector_store %arg4[%c0_10, %c0_11], %19 {strides = array<i32>} : memref<8x8xf32, #tpu.memory_space<vmem>>, vector<8x8xf32>,
    %21 = arith.mulf %2, %2 : vector<8x6x128xf32>
    %cst_12 = arith.constant dense<0.000000e+00> : vector<8x6xf32>
    %22 = vector.multi_reduction <add>, %21, %cst_12 [2] : vector<8x6x128xf32> to vector<8x6xf32>
    %cst_13 = arith.constant 1.000000e-16 : f32
    %23 = vector.broadcast %cst_13 : f32 to vector<8x6xf32>
    %24 = arith.maximumf %22, %23 : vector<8x6xf32>
    %25 = math.rsqrt %24 : vector<8x6xf32>
    %26 = vector.shape_cast %10 : vector<8x128xf32> to vector<8x1x128xf32>
    %27 = vector.broadcast %26 : vector<8x1x128xf32> to vector<8x6x128xf32>
    %28 = arith.mulf %27, %2 : vector<8x6x128xf32>
    %cst_14 = arith.constant dense<0.000000e+00> : vector<8x6xf32>
    %29 = vector.multi_reduction <add>, %28, %cst_14 [2] : vector<8x6x128xf32> to vector<8x6xf32>
    %30 = arith.mulf %29, %25 : vector<8x6xf32>
    %c0_15 = arith.constant 0 : index
    %c0_16 = arith.constant 0 : index
    %31 = vector.load %arg5[%c0_15, %c0_16] : memref<8x6xf32, #tpu.memory_space<vmem>>, vector<8x6xf32>
    tpu.vector_store %arg5[%c0_15, %c0_16], %30 {strides = array<i32>} : memref<8x6xf32, #tpu.memory_space<vmem>>, vector<8x6xf32>,
    return
  }
  func.func @transform_0(%arg0: i32) -> (i32, i32) {
    %c0_i32 = arith.constant 0 : i32
    %c0_i32_0 = arith.constant 0 : i32
    return %arg0, %c0_i32 : i32, i32
  }
  func.func @transform_1(%arg0: i32) -> (i32, i32) {
    %c0_i32 = arith.constant 0 : i32
    %c0_i32_0 = arith.constant 0 : i32
    %c0_i32_1 = arith.constant 0 : i32
    return %c0_i32, %c0_i32_0 : i32, i32
  }
  func.func @transform_2(%arg0: i32) -> (i32, i32, i32) {
    %c0_i32 = arith.constant 0 : i32
    %c0_i32_0 = arith.constant 0 : i32
    %c0_i32_1 = arith.constant 0 : i32
    return %arg0, %c0_i32, %c0_i32_0 : i32, i32, i32
  }
  func.func @transform_3(%arg0: i32) -> (i32, i32) {
    %c0_i32 = arith.constant 0 : i32
    %c0_i32_0 = arith.constant 0 : i32
    return %arg0, %c0_i32 : i32, i32
  }
  func.func @transform_4(%arg0: i32) -> (i32, i32) {
    %c0_i32 = arith.constant 0 : i32
    %c0_i32_0 = arith.constant 0 : i32
    return %arg0, %c0_i32 : i32, i32
  }
}

module attributes {stable_mosaic.version = 11 : i64} {
  func.func @_mlp_head_kernel(%arg0: i32, %arg1: memref<8x256xbf16, #tpu.memory_space<vmem>>, %arg2: memref<1x256x32xbf16, #tpu.memory_space<vmem>>, %arg3: memref<1x1x32xf32, #tpu.memory_space<vmem>>, %arg4: memref<1x32x128xbf16, #tpu.memory_space<vmem>>, %arg5: memref<1x1x128xf32, #tpu.memory_space<vmem>>, %arg6: memref<1x8x128xf32, #tpu.memory_space<vmem>>) attributes {dimension_semantics = [#tpu.dimension_semantics<parallel>], iteration_bounds = array<i64: 3>, scalar_prefetch = 0 : i64, scratch_operands = 0 : i64, tpu.core_type = #tpu.core_type<tc>, window_params = [{pipeline_mode = #tpu.pipeline_mode<synchronous>, transform_indices = @transform_0, window_bounds = array<i64: 8, 256>}, {transform_indices = @transform_1, window_bounds = array<i64: 1, 256, 32>}, {transform_indices = @transform_2, window_bounds = array<i64: 1, 1, 32>}, {transform_indices = @transform_3, window_bounds = array<i64: 1, 32, 128>}, {transform_indices = @transform_4, window_bounds = array<i64: 1, 1, 128>}, {transform_indices = @transform_5, window_bounds = array<i64: 1, 8, 128>}]} {
    %c0 = arith.constant 0 : index
    %c0_0 = arith.constant 0 : index
    %0 = vector.load %arg1[%c0, %c0_0] : memref<8x256xbf16, #tpu.memory_space<vmem>>, vector<8x256xbf16>
    %c0_1 = arith.constant 0 : index
    %c0_2 = arith.constant 0 : index
    %c0_3 = arith.constant 0 : index
    %1 = vector.load %arg2[%c0_1, %c0_2, %c0_3] : memref<1x256x32xbf16, #tpu.memory_space<vmem>>, vector<1x256x32xbf16>
    %2 = vector.shape_cast %1 : vector<1x256x32xbf16> to vector<256x32xbf16>
    %cst = arith.constant dense<0.000000e+00> : vector<8x32xf32>
    %3 = tpu.matmul %0, %2, %cst {dimension_numbers = #tpu.dot_dimension_numbers<[1], [0], [0], [1], [0, 0, 1, 1], [], []>} : vector<8x256xbf16>, vector<256x32xbf16>, vector<8x32xf32> -> vector<8x32xf32>
    %c0_4 = arith.constant 0 : index
    %c0_5 = arith.constant 0 : index
    %c0_6 = arith.constant 0 : index
    %4 = vector.load %arg3[%c0_4, %c0_5, %c0_6] : memref<1x1x32xf32, #tpu.memory_space<vmem>>, vector<1x1x32xf32>
    %5 = vector.shape_cast %4 : vector<1x1x32xf32> to vector<1x32xf32>
    %6 = vector.broadcast %5 : vector<1x32xf32> to vector<8x32xf32>
    %7 = arith.addf %3, %6 : vector<8x32xf32>
    %cst_7 = arith.constant 0.000000e+00 : f32
    %8 = vector.broadcast %cst_7 : f32 to vector<8x32xf32>
    %9 = arith.maximumf %7, %8 : vector<8x32xf32>
    %10 = arith.truncf %9 : vector<8x32xf32> to vector<8x32xbf16>
    %c0_8 = arith.constant 0 : index
    %c0_9 = arith.constant 0 : index
    %c0_10 = arith.constant 0 : index
    %11 = vector.load %arg4[%c0_8, %c0_9, %c0_10] : memref<1x32x128xbf16, #tpu.memory_space<vmem>>, vector<1x32x128xbf16>
    %12 = vector.shape_cast %11 : vector<1x32x128xbf16> to vector<32x128xbf16>
    %cst_11 = arith.constant dense<0.000000e+00> : vector<8x128xf32>
    %13 = tpu.matmul %10, %12, %cst_11 {dimension_numbers = #tpu.dot_dimension_numbers<[1], [0], [0], [1], [0, 0, 1, 1], [], []>} : vector<8x32xbf16>, vector<32x128xbf16>, vector<8x128xf32> -> vector<8x128xf32>
    %c0_12 = arith.constant 0 : index
    %c0_13 = arith.constant 0 : index
    %c0_14 = arith.constant 0 : index
    %14 = vector.load %arg5[%c0_12, %c0_13, %c0_14] : memref<1x1x128xf32, #tpu.memory_space<vmem>>, vector<1x1x128xf32>
    %15 = vector.shape_cast %14 : vector<1x1x128xf32> to vector<1x128xf32>
    %16 = vector.broadcast %15 : vector<1x128xf32> to vector<8x128xf32>
    %17 = arith.addf %13, %16 : vector<8x128xf32>
    %c0_15 = arith.constant 0 : index
    %c0_16 = arith.constant 0 : index
    %c0_17 = arith.constant 0 : index
    %18 = vector.load %arg6[%c0_15, %c0_16, %c0_17] : memref<1x8x128xf32, #tpu.memory_space<vmem>>, vector<1x8x128xf32>
    %19 = vector.shape_cast %18 : vector<1x8x128xf32> to vector<8x128xf32>
    %20 = vector.shape_cast %17 : vector<8x128xf32> to vector<1x8x128xf32>
    tpu.vector_store %arg6[%c0_15, %c0_16, %c0_17], %20 {strides = array<i32>} : memref<1x8x128xf32, #tpu.memory_space<vmem>>, vector<1x8x128xf32>,
    return
  }
  func.func @transform_0(%arg0: i32) -> (i32, i32) {
    %c0_i32 = arith.constant 0 : i32
    %c0_i32_0 = arith.constant 0 : i32
    %c0_i32_1 = arith.constant 0 : i32
    return %c0_i32, %c0_i32_0 : i32, i32
  }
  func.func @transform_1(%arg0: i32) -> (i32, i32, i32) {
    %c0_i32 = arith.constant 0 : i32
    %c0_i32_0 = arith.constant 0 : i32
    %c0_i32_1 = arith.constant 0 : i32
    return %arg0, %c0_i32, %c0_i32_0 : i32, i32, i32
  }
  func.func @transform_2(%arg0: i32) -> (i32, i32, i32) {
    %c0_i32 = arith.constant 0 : i32
    %c0_i32_0 = arith.constant 0 : i32
    %c0_i32_1 = arith.constant 0 : i32
    return %arg0, %c0_i32, %c0_i32_0 : i32, i32, i32
  }
  func.func @transform_3(%arg0: i32) -> (i32, i32, i32) {
    %c0_i32 = arith.constant 0 : i32
    %c0_i32_0 = arith.constant 0 : i32
    %c0_i32_1 = arith.constant 0 : i32
    return %arg0, %c0_i32, %c0_i32_0 : i32, i32, i32
  }
  func.func @transform_4(%arg0: i32) -> (i32, i32, i32) {
    %c0_i32 = arith.constant 0 : i32
    %c0_i32_0 = arith.constant 0 : i32
    %c0_i32_1 = arith.constant 0 : i32
    return %arg0, %c0_i32, %c0_i32_0 : i32, i32, i32
  }
  func.func @transform_5(%arg0: i32) -> (i32, i32, i32) {
    %c0_i32 = arith.constant 0 : i32
    %c0_i32_0 = arith.constant 0 : i32
    %c0_i32_1 = arith.constant 0 : i32
    return %arg0, %c0_i32, %c0_i32_0 : i32, i32, i32
  }
}

</mosaic_0001>

<bundles_post_ra>
// kernel: cl4ljp_forward.6
= control target key start
LH: loop header
LB: loop body
LE: loop exit
PB: predicated region body
PF: predicated region fallthrough
CT: control target
= control target key end

     0   :  { %vm219_vm0 = vcmask 1046528   ;;  %vm260_vm1 = vsmask.f32 6400  ;;  %vm106_vm2 = vsmask.f32 7424  ;;  %s1072_s23 = smov 64   ;;  %s1546_s0 = inlined_call_operand.vmem [shape: bf16[8,20,32], index: 0, kind: input, shape index: {}]   ;;  %s1547_s1 = inlined_call_operand.vmem [shape: bf16[160,256], index: 1, kind: input, shape index: {}]   ;;  %s1548_s2 = inlined_call_operand.vmem [shape: f32[1,256], index: 2, kind: input, shape index: {}]   ;;  %s1549_s3 = inlined_call_operand.vmem [shape: f32[16,256], index: 3, kind: input, shape index: {}]   ;;  %s1550_s4 = inlined_call_operand.vmem [shape: f32[8,256], index: 4, kind: output, shape index: {}]  }
   0x1   :  { %v1103_v0 = vld [vmem:[%s1546_s0] sm:$0xff]   ;;  %v1108_v1 = vld [vmem:[%s1546_s0 + $0x8] ss:$0 sps:$4 sm:$0x33]   ;;  %v1113_v2 = vld [vmem:[%s1546_s0 + $0x30] sm:$0xff]   ;;  %s1073_s28 = smov 96  }
   0x2   :  { %v220_v3 = vrot.slane %v1103_v0, 1  ;;  %v221_v4 = vrot.slane %v1108_v1, 1  ;;  %v1120_v5 = vld [vmem:[%s1546_s0 + $0x38] ss:$0 sps:$4 sm:$0x33]   ;;  %v108_v6 = vshrl.u32 %v1103_v0, 16 }
   0x3   :  { %v232_v7 = vrot.slane %v1113_v2, 1  ;;  %v110_v8 = vshll.u32 %v1103_v0, 16  ;;  %v115_v9 = vshll.u32 %v1108_v1, 16  ;;  %v264_v10 = vshrl.u32 %v1108_v1, 16  ;;  %v1137_v22 = vld [vmem:[%s1546_s0 + $0xc] sm:$0xff]   ;;  %v1161_v44 = vld [vmem:[%s1546_s0 + $0x3c] sm:$0xff]  }
   0x4   :  { %v222_v11 = vsel %vm219_vm0, %v220_v3, %v221_v4  ;;  %v233_v12 = vrot.slane %v1120_v5, 1  ;;  %v261_v13 = vrot.slane %v108_v6, 1  ;;  %v156_v17 = vshrl.u32 %v1113_v2, 16  ;;  %v1142_v27 = vld [vmem:[%s1546_s0 + $0x14] ss:$0 sps:$4 sm:$0x33]  }
   0x5   :  { %244 = vrot.lane.b32.xlu0 %v222_v11, %s1072_s23  ;;  %v262_v14 = vrot.slane %v110_v8, 2  ;;  %v266_v15 = vrot.slane %v264_v10, 1  ;;  %v267_v16 = vrot.slane %v115_v9, 2  ;;  %v158_v19 = vshll.u32 %v1113_v2, 16  ;;  %s1074_s7 = smov 32   ;;  %v1170_v53 = vld [vmem:[%s1546_s0 + $0x18] sm:$0xff]  }
   0x6   :  { %v234_v18 = vsel %vm219_vm0, %v232_v7, %v233_v12  ;;  %v163_v20 = vshll.u32 %v1120_v5, 16  ;;  %v112_v21 = vrot.slane %v110_v8, 1  ;;  %v117_v25 = vrot.slane %v115_v9, 1  ;;  %v1154_v39 = vld [vmem:[%s1546_s0 + $0x44] ss:$0 sps:$4 sm:$0x33]  }
   0x7   :  { %v263_v23 = vor.u32 %v262_v14, %v261_v13  ;;  %v268_v24 = vor.u32 %v267_v16, %v266_v15  ;;  %v297_v26 = vrot.slane %v156_v17, 1  ;;  %v160_v28 = vrot.slane %v158_v19, 1  ;;  %v1183_v4 = vld [vmem:[%s1546_s0 + $0x20] ss:$0 sps:$4 sm:$0x33]  }
   0x8   :  { %v165_v29 = vrot.slane %v163_v20, 1  ;;  %v113_v30 = vor.u32 %v112_v21, %v108_v6  ;;  %v298_v31 = vrot.slane %v158_v19, 2  ;;  %v300_v33 = vshrl.u32 %v1120_v5, 16  ;;  %v1201_v21 = vld [vmem:[%s1546_s0 + $0x48] sm:$0xff]  }
   0x9   :  { %252 = vrot.lane.b32.xlu0 %v234_v18, %s1072_s23  ;;  %v269_v32 = vsel %vm260_vm1, %v263_v23, %v268_v24  ;;  %v303_v34 = vrot.slane %v163_v20, 2  ;;  %v120_v35 = vshrl.u32 %v1137_v22, 16  ;;  %v161_v36 = vor.u32 %v160_v28, %v156_v17  ;;  %v1195_v18 = vld [vmem:[%s1546_s0 + $0x50] ss:$0 sps:$4 sm:$0x33]  }
   0xa   :  { %333 = vrot.lane.b32.xlu1 %v269_v32, %s1073_s28  ;;  %v118_v37 = vsel %vm106_vm2, %v113_v30, %v117_v25  ;;  %v122_v38 = vshll.u32 %v1137_v22, 16  ;;  %v299_v40 = vor.u32 %v298_v31, %v297_v26  ;;  %v302_v41 = vrot.slane %v300_v33, 1  ;;  %v1042_v31 = vld [vmem:[%s1547_s1 + $0x74] ss:$8 sps:$4 sm:$0xff]  }
   0xb   :  { %v127_v42 = vshll.u32 %v1142_v27, 16  ;;  %v223_v43 = vrot.slane %v1137_v22, 1  ;;  %v166_v45 = vsel %vm106_vm2, %v161_v36, %v165_v29  ;;  %v270_v47 = vrot.slane %v120_v35, 1  ;;  %v1214_v36 = vld [vmem:[%s1546_s0 + $0x24] sm:$0xff]   ;;  %577 = vmatprep.subr.bf16.mxu0 %v1042_v31  ;;  %1003 = vmatprep.subr.bf16.mxu1 %v1042_v31 }
   0xc   :  { %v124_v46 = vrot.slane %v122_v38, 1  ;;  %v271_v48 = vrot.slane %v122_v38, 2  ;;  %v304_v49 = vor.u32 %v303_v34, %v302_v41  ;;  %v224_v51 = vrot.slane %v1142_v27, 1 }
   0xd   :  { %203 = vrot.lane.b32.xlu0 %v118_v37, %s1074_s7  ;;  %v129_v50 = vrot.slane %v127_v42, 1  ;;  %v273_v52 = vshrl.u32 %v1142_v27, 16  ;;  %v276_v56 = vrot.slane %v127_v42, 2  ;;  %v168_v57 = vshrl.u32 %v1161_v44, 16  ;;  %v1044_v42 = vld [vmem:[%s1547_s1 + $0x70] ss:$8 sps:$4 sm:$0xff]  }
   0xe   :  { %211 = vrot.lane.b32.xlu1 %v166_v45, %s1074_s7  ;;  %v125_v54 = vor.u32 %v124_v46, %v120_v35  ;;  %v272_v55 = vor.u32 %v271_v48, %v270_v47  ;;  %v305_v58 = vsel %vm260_vm1, %v299_v40, %v304_v49  ;;  %v170_v60 = vshll.u32 %v1161_v44, 16  ;;  %v1219_v37 = vld [vmem:[%s1546_s0 + $0x2c] ss:$0 sps:$4 sm:$0x33]   ;;  %578 = vmatpush1.bf16.msra.mxu0 %v1044_v42 }
   0xf   :  { %v275_v59 = vrot.slane %v273_v52, 1  ;;  %v175_v61 = vshll.u32 %v1154_v39, 16  ;;  %v235_v63 = vrot.slane %v1161_v44, 1  ;;  %v236_v3 = vrot.slane %v1154_v39, 1  ;;  %v1045_v47 = vld [vmem:[%s1547_s1 + $0x64] ss:$8 sps:$4 sm:$0xff]   ;;  %1013 = vmatpush1.bf16.msra.mxu1 %v1044_v42 }
  0x10   :  { %v130_v62 = vsel %vm106_vm2, %v125_v54, %v129_v50  ;;  %v172_v7 = vrot.slane %v170_v60, 1  ;;  %v306_v9 = vrot.slane %v168_v57, 1  ;;  %v225_v10 = vsel %vm219_vm0, %v223_v43, %v224_v51  ;;  %v1047_v52 = vld [vmem:[%s1547_s1 + $0x60] ss:$8 sps:$4 sm:$0xff]   ;;  %579 = vmatprep.subr.bf16.mxu0 %v1045_v47  ;;  %1004 = vmatprep.subr.bf16.mxu1 %v1045_v47 }
  0x11   :  { %205 = vrot.lane.b32.xlu0 %v130_v62, %s1074_s7  ;;  %v277_v6 = vor.u32 %v276_v56, %v275_v59  ;;  %v177_v8 = vrot.slane %v175_v61, 1  ;;  %v307_v11 = vrot.slane %v170_v60, 2  ;;  %v309_v12 = vshrl.u32 %v1154_v39, 16 }
  0x12   :  { %341 = vrot.lane.b32.xlu1 %v305_v58, %s1073_s28  ;;  %v312_v13 = vrot.slane %v175_v61, 2  ;;  %v173_v15 = vor.u32 %v172_v7, %v168_v57  ;;  %v132_v16 = vshrl.u32 %v1170_v53, 16  ;;  %v134_v17 = vshll.u32 %v1170_v53, 16  ;;  %v1048_v58 = vld [vmem:[%s1547_s1 + $0x54] ss:$8 sps:$4 sm:$0xff]   ;;  %580 = vmatpush1.bf16.msra.mxu0 %v1047_v52 }
  0x13   :  { %v278_v14 = vsel %vm260_vm1, %v272_v55, %v277_v6  ;;  %v311_v19 = vrot.slane %v309_v12, 1  ;;  %v139_v20 = vshll.u32 %v1183_v4, 16  ;;  %v237_v26 = vsel %vm219_vm0, %v235_v63, %v236_v3  ;;  %v1249_v63 = vld [vmem:[%s1546_s0 + $0x5c] ss:$0 sps:$4 sm:$0x33]   ;;  %1014 = vmatpush1.bf16.msra.mxu1 %v1047_v52  ;;  %581 = vmatprep.subr.bf16.mxu0 %v1048_v58 }
  0x14   :  { %v136_v23 = vrot.slane %v134_v17, 1  ;;  %v279_v24 = vrot.slane %v132_v16, 1  ;;  %v280_v25 = vrot.slane %v134_v17, 2  ;;  %v308_v28 = vor.u32 %v307_v11, %v306_v9  ;;  %v1257_v9 = vld [vmem:[%s1546_s0 + $0x54] sm:$0xff]   ;;  %1005 = vmatprep.subr.bf16.mxu1 %v1048_v58 }
  0x15   :  { %335 = vrot.lane.b32.xlu0 %v278_v14, %s1073_s28  ;;  %v141_v29 = vrot.slane %v139_v20, 1  ;;  %v282_v30 = vshrl.u32 %v1183_v4, 16  ;;  %v178_v32 = vsel %vm106_vm2, %v173_v15, %v177_v8  ;;  %v313_v33 = vor.u32 %v312_v13, %v311_v19  ;;  %v1050_v14 = vld [vmem:[%s1547_s1 + $0x50] ss:$8 sps:$4 sm:$0xff]   ;;  %v1051_v15 = vld [vmem:[%s1547_s1 + $0x44] ss:$8 sps:$4 sm:$0xff]  }
  0x16   :  { %246 = vrot.lane.b32.xlu1 %v225_v10, %s1072_s23  ;;  %v137_v34 = vor.u32 %v136_v23, %v132_v16  ;;  %v285_v35 = vrot.slane %v139_v20, 2  ;;  %v226_v38 = vrot.slane %v1170_v53, 1  ;;  %v182_v41 = vshll.u32 %v1201_v21, 16  ;;  %582 = vmatpush1.bf16.msra.mxu0 %v1050_v14 }
  0x17   :  { %v284_v40 = vrot.slane %v282_v30, 1  ;;  %v227_v43 = vrot.slane %v1183_v4, 1  ;;  %v180_v45 = vshrl.u32 %v1201_v21, 16  ;;  %v187_v46 = vshll.u32 %v1195_v18, 16  ;;  %1015 = vmatpush1.bf16.msra.mxu1 %v1050_v14  ;;  %583 = vmatprep.subr.bf16.mxu0 %v1051_v15 }
  0x18   :  { %v142_v48 = vsel %vm106_vm2, %v137_v34, %v141_v29  ;;  %v281_v49 = vor.u32 %v280_v25, %v279_v24  ;;  %v184_v51 = vrot.slane %v182_v41, 1  ;;  %v314_v54 = vsel %vm260_vm1, %v308_v28, %v313_v33  ;;  %v1053_v34 = vld [vmem:[%s1547_s1 + $0x40] ss:$8 sps:$4 sm:$0xff]   ;;  %1006 = vmatprep.subr.bf16.mxu1 %v1051_v15 }
  0x19   :  { %254 = vrot.lane.b32.xlu0 %v237_v26, %s1072_s23  ;;  %v286_v50 = vor.u32 %v285_v35, %v284_v40  ;;  %v315_v55 = vrot.slane %v180_v45, 1  ;;  %v316_v56 = vrot.slane %v182_v41, 2  ;;  %v318_v57 = vshrl.u32 %v1195_v18, 16  ;;  %v1054_v40 = vld [vmem:[%s1547_s1 + $0x34] ss:$8 sps:$4 sm:$0xff]  }
  0x1a   :  { %213 = vrot.lane.b32.xlu1 %v178_v32, %s1074_s7  ;;  %v238_v59 = vrot.slane %v1201_v21, 1  ;;  %v239_v60 = vrot.slane %v1195_v18, 1  ;;  %v321_v61 = vrot.slane %v187_v46, 2  ;;  %v146_v62 = vshll.u32 %v1214_v36, 16  ;;  %584 = vmatpush1.bf16.msra.mxu0 %v1053_v34 }
  0x1b   :  { %v189_v3 = vrot.slane %v187_v46, 1  ;;  %v320_v6 = vrot.slane %v318_v57, 1  ;;  %v144_v7 = vshrl.u32 %v1214_v36, 16  ;;  %v151_v8 = vshll.u32 %v1219_v37, 16  ;;  %1016 = vmatpush1.bf16.msra.mxu1 %v1053_v34  ;;  %585 = vmatprep.subr.bf16.mxu0 %v1054_v40  ;;  %v1057_v57 = vld [vmem:[%s1547_s1 + $0x24] ss:$8 sps:$4 sm:$0xff]  }
  0x1c   :  { %v228_v10 = vsel %vm219_vm0, %v226_v38, %v227_v43  ;;  %v287_v11 = vsel %vm260_vm1, %v281_v49, %v286_v50  ;;  %v185_v12 = vor.u32 %v184_v51, %v180_v45  ;;  %v148_v13 = vrot.slane %v146_v62, 1  ;;  %v1056_v50 = vld [vmem:[%s1547_s1 + $0x30] ss:$8 sps:$4 sm:$0xff]   ;;  %1007 = vmatprep.subr.bf16.mxu1 %v1054_v40  ;;  %v1066_v34 = vld [vmem:[%s1547_s1 + $0x94] ss:$8 sps:$4 sm:$0xff]  }
  0x1d   :  { %207 = vrot.lane.b32.xlu0 %v142_v48, %s1074_s7  ;;  %v317_v16 = vor.u32 %v316_v56, %v315_v55  ;;  %v229_v17 = vrot.slane %v1214_v36, 1  ;;  %v230_v19 = vrot.slane %v1219_v37, 1  ;;  %v291_v20 = vshrl.u32 %v1219_v37, 16  ;;  %v1071_v40 = vld [vmem:[%s1547_s1 + $0x80] ss:$8 sps:$4 sm:$0xff]  }
  0x1e   :  { %343 = vrot.lane.b32.xlu1 %v314_v54, %s1073_s28  ;;  %v322_v23 = vor.u32 %v321_v61, %v320_v6  ;;  %v288_v24 = vrot.slane %v144_v7, 1  ;;  %v289_v25 = vrot.slane %v146_v62, 2  ;;  %v294_v26 = vrot.slane %v151_v8, 2  ;;  %586 = vmatpush1.bf16.msra.mxu0 %v1056_v50 }
  0x1f   :  { %v149_v28 = vor.u32 %v148_v13, %v144_v7  ;;  %v153_v29 = vrot.slane %v151_v8, 1  ;;  %v293_v30 = vrot.slane %v291_v20, 1  ;;  %v194_v31 = vshll.u32 %v1257_v9, 16  ;;  %1017 = vmatpush1.bf16.msra.mxu1 %v1056_v50  ;;  %587 = vmatprep.subr.bf16.mxu0 %v1057_v57 }
  0x20   :  { %v240_v32 = vsel %vm219_vm0, %v238_v59, %v239_v60  ;;  %v199_v33 = vshll.u32 %v1249_v63, 16  ;;  %v190_v35 = vsel %vm106_vm2, %v185_v12, %v189_v3  ;;  %v1281_v38 = vsel %vm219_vm0, %v229_v17, %v230_v19  ;;  %1008 = vmatprep.subr.bf16.mxu1 %v1057_v57 }
  0x21   :  { %337 = vrot.lane.b32.xlu0 %v287_v11, %s1073_s28  ;;  %vm374_vm3 = vcmask 261120   ;;  %v290_v41 = vor.u32 %v289_v25, %v288_v24  ;;  %v295_v42 = vor.u32 %v294_v26, %v293_v30  ;;  %v192_v43 = vshrl.u32 %v1257_v9, 16  ;;  %v1059_v11 = vld [vmem:[%s1547_s1 + $0x20] ss:$8 sps:$4 sm:$0xff]   ;;  %v1062_v26 = vld [vmem:[%s1547_s1 + $0x10] ss:$8 sps:$4 sm:$0xff]  }
  0x22   :  { %248 = vrot.lane.b32.xlu1 %v228_v10, %s1072_s23  ;;  %v196_v45 = vrot.slane %v194_v31, 1  ;;  %v323_v46 = vsel %vm260_vm1, %v317_v16, %v322_v23  ;;  %v154_v47 = vsel %vm106_vm2, %v149_v28, %v153_v29  ;;  %v241_v48 = vrot.slane %v1257_v9, 1  ;;  %588 = vmatpush1.bf16.msra.mxu0 %v1059_v11 }
  0x23   :  { %v242_v49 = vrot.slane %v1249_v63, 1  ;;  %v201_v51 = vrot.slane %v199_v33, 1  ;;  %v1296_v52 = vrot.slane %v192_v43, 1  ;;  %v327_v54 = vshrl.u32 %v1249_v63, 16  ;;  %1018 = vmatpush1.bf16.msra.mxu1 %v1059_v11 }
  0x24   :  { %vm349_vm4 = vcmask 1045504   ;;  %v325_v55 = vrot.slane %v194_v31, 2  ;;  %v330_v56 = vrot.slane %v199_v33, 2  ;;  %v350_v58 = vrot.slane %v1103_v0, 2 }
  0x25   :  { %256 = vrot.lane.b32.xlu0 %v240_v32, %s1072_s23  ;;  %v351_v59 = vrot.slane %v1108_v1, 2  ;;  %v296_v60 = vsel %vm260_vm1, %v290_v41, %v295_v42  ;;  %v197_v61 = vor.u32 %v196_v45, %v192_v43  ;;  %v362_v62 = vrot.slane %v1113_v2, 2  ;;  %v1065_v32 = vld [vmem:[%s1547_s1] ss:$8 sps:$4 sm:$0xff]  }
  0x26   :  { %215 = vrot.lane.b32.xlu1 %v190_v35, %s1074_s7  ;;  %v363_v3 = vrot.slane %v1120_v5, 2  ;;  %v353_v7 = vrot.slane %v1137_v22, 2  ;;  %v354_v8 = vrot.slane %v1142_v27, 2  ;;  %v365_v10 = vrot.slane %v1161_v44, 2  ;;  %v1060_v27 = vld [vmem:[%s1547_s1 + $0x14] ss:$8 sps:$4 sm:$0xff]  }
  0x27   :  { %v352_v6 = vsel %vm349_vm4, %v350_v58, %v351_v59  ;;  %v329_v1 = vrot.slane %v327_v54, 1  ;;  %v366_v12 = vrot.slane %v1154_v39, 2  ;;  %v356_v13 = vrot.slane %v1170_v53, 2  ;;  %589 = vmatprep.subr.bf16.mxu0 %v1060_v27  ;;  %1009 = vmatprep.subr.bf16.mxu1 %v1060_v27  ;;  %v1068_v35 = vld [vmem:[%s1547_s1 + $0x90] ss:$8 sps:$4 sm:$0xff]  }
  0x28   :  { %v364_v5 = vsel %vm349_vm4, %v362_v62, %v363_v3  ;;  %v1323_v14 = vsel %vm349_vm4, %v353_v7, %v354_v8  ;;  %v357_v15 = vrot.slane %v1183_v4, 2  ;;  %v368_v16 = vrot.slane %v1201_v21, 2  ;;  %995 = vmatprep.mubr.msk.bf16.mxu0 %vm374_vm3, %v352_v6  ;;  %590 = vmatpush1.bf16.msra.mxu0 %v1062_v26 }
  0x29   :  { %209 = vrot.lane.b32.xlu0 %v154_v47, %s1074_s7  ;;  %v369_v17 = vrot.slane %v1195_v18, 2  ;;  %v1330_v39 = vsel %vm349_vm4, %v365_v10, %v366_v12  ;;  %v359_v19 = vrot.slane %v1214_v36, 2  ;;  %v360_v20 = vrot.slane %v1219_v37, 2  ;;  %999 = vmatprep.mubr.msk.bf16.mxu1 %vm374_vm3, %v364_v5 }
  0x2a   :  { %345 = vrot.lane.b32.xlu1 %v323_v46, %s1073_s28  ;;  %v371_v23 = vrot.slane %v1257_v9, 2  ;;  %v1338_v4 = vsel %vm349_vm4, %v356_v13, %v357_v15  ;;  %v372_v24 = vrot.slane %v1249_v63, 2  ;;  %v243_v25 = vsel %vm219_vm0, %v241_v48, %v242_v49  ;;  %v1063_v63 = vld [vmem:[%s1547_s1 + $0x4] ss:$8 sps:$4 sm:$0xff]   ;;  %1019 = vmatpush1.bf16.msra.mxu1 %v1062_v26  ;;  %v690_v26 = vld [vmem:[%s1548_s2] sm:$0x3] }
  0x2b   :  { %v1341_v18 = vsel %vm349_vm4, %v368_v16, %v369_v17  ;;  %v326_v37 = vor.u32 %v325_v55, %v1296_v52  ;;  %v1352_v28 = vsel %vm349_vm4, %v359_v19, %v360_v20  ;;  %v202_v29 = vsel %vm106_vm2, %v197_v61, %v201_v51  ;;  %591 = vmatprep.subr.bf16.mxu0 %v1063_v63 }
  0x2c   :  { %v331_v30 = vor.u32 %v330_v56, %v329_v1  ;;  %v1359_v31 = vsel %vm349_vm4, %v371_v23, %v372_v24  ;;  %1010 = vmatprep.subr.bf16.mxu1 %v1063_v63  ;;  %592 = vmatpush1.bf16.msra.mxu0 %v1065_v32  ;;  %vm391_vm5 = vcmask 523264   ;;  %vm408_vm6 = vcmask 785408  }
  0x2d   :  { %339 = vrot.lane.b32.xlu0 %v296_v60, %s1073_s28  ;;  %605 = vmatprep.subr.bf16.mxu0 %v1066_v34  ;;  %v692_v24 = vlaneseq  ;;  %vm930_vm7 = vcmask 1041409   ;;  %vm932_vm8 = vcmask 1042434   ;;  %vm934_vm9 = vcmask 1043459  }
  0x2e   :  { %250 = vrot.lane.b32.xlu1 %v1281_v38, %s1072_s23  ;;  %v332_v33 = vsel %vm260_vm1, %v326_v37, %v331_v30  ;;  %1020 = vmatpush1.bf16.msra.mxu1 %v1065_v32  ;;  %v1069_v38 = vld [vmem:[%s1547_s1 + $0x84] ss:$8 sps:$4 sm:$0xff]   ;;  %vm936_vm10 = vcmask 1044484   ;;  %vm938_vm11 = vcmask 1045509   ;;  %vm940_vm12 = vcmask 1046534  }
  0x2f   :  { %1011 = vmatprep.subr.bf16.mxu1 %v1066_v34  ;;  %vm942_vm13 = vcmask 1047559  }
  0x30   :  { %606 = vmatpush2.bf16.msra.mxu0 %v1068_v35 }
  0x31   :  { %258 = vrot.lane.b32.xlu0 %v243_v25, %s1072_s23  ;;  %607 = vmatprep.subr.bf16.mxu0 %v1069_v38  ;;  %v693_v25 = vshrl.u32 %v692_v24, 7 }
  0x32   :  { %217 = vrot.lane.b32.xlu1 %v202_v29, %s1074_s7  ;;  %1021 = vmatpush2.bf16.msra.mxu1 %v1068_v35 }
  0x33   :  { %1012 = vmatprep.subr.bf16.mxu1 %v1069_v38  ;;  %v694_v37 = vsub.s32 0, %v693_v25 }
  0x34   :  { %608 = vmatpush2.bf16.msra.mxu0 %v1071_v40 }
  0x35   :  { %v1427_v29 = vrot.slane %v690_v26, %v694_v37 }
  0x36   :  { %347 = vrot.lane.b32.xlu1 %v332_v33, %s1073_s28  ;;  %1022 = vmatpush2.bf16.msra.mxu1 %v1071_v40 }
  0x77   :  { %v245_v41 = vpop.permute.xlu0 %244 }
  0x7b   :  { %v253_v42 = vpop.permute.xlu0 %252 }
  0x7c   :  { %v334_v43 = vpop.permute.xlu1 %333 }
  0x7f   :  { %v204_v45 = vpop.permute.xlu0 %203 }
  0x80   :  { %v212_v46 = vpop.permute.xlu1 %211  ;;  %v376_v47 = vsel %vm374_vm3, %v1103_v0, %v204_v45 }
  0x81   :  { %v384_v48 = vsel %vm374_vm3, %v1113_v2, %v212_v46  ;;  %v393_v49 = vsel %vm391_vm5, %v376_v47, %v245_v41 }
  0x82   :  { %v410_v50 = vsel %vm408_vm6, %v393_v49, %v334_v43  ;;  %v401_v54 = vsel %vm391_vm5, %v384_v48, %v253_v42  ;;  %v1438_v42 = vld [vmem:[%s1549_s3] sm:$0xff]  ;;  %v1443_v43 = vld [vmem:[%s1549_s3 + $0x10] sm:$0xff] }
  0x83   :  { %610 = vmatmul.mubr.bf16.vlgmr.msra.gmra.mxu0 %v410_v50  ;;  %v206_v51 = vpop.permute.xlu0 %205  ;;  %v1449_v50 = vld [vmem:[%s1549_s3 + $0x8] sm:$0xff] }
  0x84   :  { %v342_v52 = vpop.permute.xlu1 %341  ;;  %996 = vmatprep.mubr.msk.bf16.mxu0 %vm374_vm3, %v1323_v14  ;;  %v378_v0 = vsel %vm374_vm3, %v1137_v22, %v206_v51 }
  0x85   :  { %v422_v55 = vsel %vm408_vm6, %v401_v54, %v342_v52  ;;  %v1455_v54 = vld [vmem:[%s1549_s3 + $0x18] sm:$0xff] }
  0x86   :  { %650 = vmatmul.mubr.bf16.vlgmr.msra.gmra.mxu1 %v422_v55 }
  0x87   :  { %v336_v56 = vpop.permute.xlu0 %335  ;;  %1000 = vmatprep.mubr.msk.bf16.mxu1 %vm374_vm3, %v1330_v39 }
  0x88   :  { %v247_v2 = vpop.permute.xlu1 %246 }
  0x89   :  { %v395_v57 = vsel %vm391_vm5, %v378_v0, %v247_v2 }
  0x8a   :  { %v413_v58 = vsel %vm408_vm6, %v395_v57, %v336_v56 }
  0x8b   :  { %620 = vmatmul.mubr.bf16.gmra.mxu0 %v413_v58  ;;  %v255_v59 = vpop.permute.xlu0 %254 }
  0x8c   :  { %v214_v60 = vpop.permute.xlu1 %213  ;;  %997 = vmatprep.mubr.msk.bf16.mxu0 %vm374_vm3, %v1338_v4 }
  0x8d   :  { %v386_v61 = vsel %vm374_vm3, %v1161_v44, %v214_v60 }
  0x8e   :  { %v403_v62 = vsel %vm391_vm5, %v386_v61, %v255_v59 }
  0x8f   :  { %v208_v22 = vpop.permute.xlu0 %207 }
  0x90   :  { %v344_v3 = vpop.permute.xlu1 %343  ;;  %v380_v7 = vsel %vm374_vm3, %v1170_v53, %v208_v22 }
  0x91   :  { %v425_v6 = vsel %vm408_vm6, %v403_v62, %v344_v3 }
  0x92   :  { %660 = vmatmul.mubr.bf16.gmra.mxu1 %v425_v6 }
  0x93   :  { %v338_v8 = vpop.permute.xlu0 %337  ;;  %1001 = vmatprep.mubr.msk.bf16.mxu1 %vm374_vm3, %v1341_v18 }
  0x94   :  { %v249_v10 = vpop.permute.xlu1 %248 }
  0x95   :  { %v397_v1 = vsel %vm391_vm5, %v380_v7, %v249_v10 }
  0x96   :  { %v416_v11 = vsel %vm408_vm6, %v397_v1, %v338_v8 }
  0x97   :  { %630 = vmatmul.mubr.bf16.gmra.mxu0 %v416_v11  ;;  %v257_v44 = vpop.permute.xlu0 %256 }
  0x98   :  { %v216_v5 = vpop.permute.xlu1 %215  ;;  %998 = vmatprep.mubr.msk.bf16.mxu0 %vm374_vm3, %v1352_v28  ;;  %v698_v28 = vsub.s32 1, %v693_v25 }
  0x99   :  { %v388_v12 = vsel %vm374_vm3, %v1201_v21, %v216_v5 }
  0x9a   :  { %v405_v13 = vsel %vm391_vm5, %v388_v12, %v257_v44  ;;  %v1429_v30 = vrot.slane %v690_v26, %v698_v28 }
  0x9b   :  { %v210_v53 = vpop.permute.xlu0 %209 }
  0x9c   :  { %v346_v27 = vpop.permute.xlu1 %345  ;;  %v382_v15 = vsel %vm374_vm3, %v1214_v36, %v210_v53 }
  0x9d   :  { %v428_v14 = vsel %vm408_vm6, %v405_v13, %v346_v27 }
  0x9e   :  { %670 = vmatmul.mubr.bf16.gmra.mxu1 %v428_v14 }
  0x9f   :  { %v340_v16 = vpop.permute.xlu0 %339  ;;  %1002 = vmatprep.mubr.msk.bf16.mxu1 %vm374_vm3, %v1359_v31 }
  0xa0   :  { %v251_v17 = vpop.permute.xlu1 %250 }
  0xa1   :  { %v399_v39 = vsel %vm391_vm5, %v382_v15, %v251_v17 }
  0xa2   :  { %v419_v19 = vsel %vm408_vm6, %v399_v39, %v340_v16 }
  0xa3   :  { %640 = vmatmul.mubr.bf16.gmra.mxu0 %v419_v19  ;;  %v259_v23 = vpop.permute.xlu0 %258 }
  0xa4   :  { %v218_v21 = vpop.permute.xlu1 %217 }
  0xa5   :  { %v390_v20 = vsel %vm374_vm3, %v1257_v9, %v218_v21 }
  0xa6   :  { %v407_v4 = vsel %vm391_vm5, %v390_v20, %v259_v23 }
  0xa8   :  { %v348_v18 = vpop.permute.xlu1 %347 }
  0xa9   :  { %v431_v36 = vsel %vm408_vm6, %v407_v4, %v348_v18 }
  0xaa   :  { %680 = vmatmul.mubr.bf16.gmra.mxu1 %v431_v36 }
 0x143   :  { %v611_v9 = vpop.f32.mrf.mxu0 }
 0x144   :  { %v702_v63 = vadd.f32 %v1427_v29, %v611_v9 }
 0x145   :  { %v613_v31 = vpop.f32.mrf.mxu0 }
 0x146   :  { %v703_v32 = vadd.f32 %v1429_v30, %v613_v31  ;;  %v651_v33 = vpop.f32.mrf.mxu1  ;;  %v734_v38 = vmax.f32 %v702_v63, 0.0 }
 0x147   :  { %v718_v34 = vadd.f32 %v1427_v29, %v651_v33  ;;  %v615_v35 = vpop.f32.mrf.mxu0 }
 0x148   :  { %v704_v40 = vadd.f32 %v1427_v29, %v615_v35  ;;  %v653_v41 = vpop.f32.mrf.mxu1  ;;  %v735_v46 = vmax.f32 %v703_v32, 0.0  ;;  %v770_v56 = vmul.f32 %v1438_v42, %v734_v38 }
 0x149   :  { %v617_v45 = vpop.f32.mrf.mxu0  ;;  %v750_v51 = vmax.f32 %v718_v34, 0.0  ;;  %v719_v52 = vadd.f32 %v1429_v30, %v653_v41 }
 0x14a   :  { %v736_v47 = vmax.f32 %v704_v40, 0.0  ;;  %v705_v48 = vadd.f32 %v1429_v30, %v617_v45  ;;  %v655_v49 = vpop.f32.mrf.mxu1  ;;  %v771_v22 = vmul.f32 %v1449_v50, %v735_v46 }
 0x14b   :  { %v720_v55 = vadd.f32 %v1427_v29, %v655_v49  ;;  %v621_v0 = vpop.f32.mrf.mxu0  ;;  %v786_v6 = vmul.f32 %v1438_v42, %v750_v51  ;;  %v751_v7 = vmax.f32 %v719_v52, 0.0 }
 0x14c   :  { %v772_v2 = vmul.f32 %v1443_v43, %v736_v47  ;;  %v737_v57 = vmax.f32 %v705_v48, 0.0  ;;  %v657_v58 = vpop.f32.mrf.mxu1  ;;  %v706_v5 = vadd.f32 %v1427_v29, %v621_v0 }
 0x14d   :  { %v752_v59 = vmax.f32 %v720_v55, 0.0  ;;  %v721_v60 = vadd.f32 %v1429_v30, %v657_v58  ;;  %v623_v61 = vpop.f32.mrf.mxu0  ;;  %v787_v17 = vmul.f32 %v1449_v50, %v751_v7 }
 0x14e   :  { %v802_v62 = vmax.f32 %v770_v56, %v772_v2  ;;  %v773_v3 = vmul.f32 %v1455_v54, %v737_v57  ;;  %v707_v53 = vadd.f32 %v1429_v30, %v623_v61  ;;  %v738_v20 = vmax.f32 %v706_v5, 0.0 }
 0x14f   :  { %v788_v8 = vmul.f32 %v1443_v43, %v752_v59  ;;  %v753_v10 = vmax.f32 %v721_v60, 0.0  ;;  %v625_v1 = vpop.f32.mrf.mxu0 }
 0x150   :  { %v803_v11 = vrot.slane %v802_v62, 4  ;;  %v809_v44 = vmax.f32 %v771_v22, %v773_v3  ;;  %v708_v13 = vadd.f32 %v1427_v29, %v625_v1  ;;  %v739_v36 = vmax.f32 %v707_v53, 0.0 }
 0x151   :  { %v858_v12 = vmax.f32 %v786_v6, %v788_v8  ;;  %v627_v27 = vpop.f32.mrf.mxu0  ;;  %v789_v14 = vmul.f32 %v1455_v54, %v753_v10  ;;  %v774_v63 = vmul.f32 %v1438_v42, %v738_v20 }
 0x152   :  { %v709_v15 = vadd.f32 %v1429_v30, %v627_v27  ;;  %v661_v16 = vpop.f32.mrf.mxu1  ;;  %v740_v39 = vmax.f32 %v708_v13, 0.0  ;;  %v804_v19 = vmax.f32 %v802_v62, %v803_v11  ;;  %v810_v21 = vrot.slane %v809_v44, 4 }
 0x153   :  { %v859_v18 = vrot.slane %v858_v12, 4  ;;  %v865_v24 = vmax.f32 %v787_v17, %v789_v14  ;;  %v722_v31 = vadd.f32 %v1427_v29, %v661_v16  ;;  %v775_v34 = vmul.f32 %v1449_v50, %v739_v36 }
 0x154   :  { %v741_v23 = vmax.f32 %v709_v15, 0.0  ;;  %v663_v4 = vpop.f32.mrf.mxu1  ;;  %v776_v25 = vmul.f32 %v1443_v43, %v740_v39  ;;  %v805_v28 = vrot.slane %v804_v19, 2  ;;  %v811_v9 = vmax.f32 %v809_v44, %v810_v21 }
 0x155   :  { %v860_v33 = vmax.f32 %v858_v12, %v859_v18  ;;  %v866_v38 = vrot.slane %v865_v24, 4  ;;  %v754_v48 = vmax.f32 %v722_v31, 0.0  ;;  %v723_v55 = vadd.f32 %v1429_v30, %v663_v4 }
 0x156   :  { %v777_v37 = vmul.f32 %v1455_v54, %v741_v23  ;;  %v665_v32 = vpop.f32.mrf.mxu1  ;;  %v816_v40 = vmax.f32 %v774_v63, %v776_v25  ;;  %v806_v46 = vmax.f32 %v804_v19, %v805_v28  ;;  %v812_v47 = vrot.slane %v811_v9, 2 }
 0x157   :  { %v631_v26 = vpop.f32.mrf.mxu0  ;;  %v861_v52 = vrot.slane %v860_v33, 2  ;;  %v867_v0 = vmax.f32 %v865_v24, %v866_v38  ;;  %v724_v2 = vadd.f32 %v1427_v29, %v665_v32  ;;  %v790_v6 = vmul.f32 %v1438_v42, %v754_v48 }
 0x158   :  { %v823_v41 = vmax.f32 %v775_v34, %v777_v37  ;;  %v710_v49 = vadd.f32 %v1427_v29, %v631_v26  ;;  %v667_v51 = vpop.f32.mrf.mxu1  ;;  %v817_v56 = vrot.slane %v816_v40, 4  ;;  %v807_v62 = vrot.slane %v806_v46, 1 }
 0x159   :  { %v633_v35 = vpop.f32.mrf.mxu0  ;;  %v813_v3 = vmax.f32 %v811_v9, %v812_v47  ;;  %v725_v7 = vadd.f32 %v1429_v30, %v667_v51  ;;  %v755_v10 = vmax.f32 %v723_v55, 0.0  ;;  %v862_v5 = vmax.f32 %v860_v33, %v861_v52 }
 0x15a   :  { %v711_v57 = vadd.f32 %v1429_v30, %v633_v35  ;;  %v824_v60 = vrot.slane %v823_v41, 4  ;;  %v742_v61 = vmax.f32 %v710_v49, 0.0  ;;  %v868_v12 = vrot.slane %v867_v0, 2 }
 0x15b   :  { %v635_v45 = vpop.f32.mrf.mxu0  ;;  %v818_v53 = vmax.f32 %v816_v40, %v817_v56  ;;  %v756_v13 = vmax.f32 %v724_v2, 0.0  ;;  %v1486_v19 = vmax.f32 %v806_v46, %v807_v62  ;;  %v814_v21 = vrot.slane %v813_v3, 1 }
 0x15c   :  { %v712_v22 = vadd.f32 %v1427_v29, %v635_v45  ;;  %v743_v1 = vmax.f32 %v711_v57, 0.0  ;;  %v825_v14 = vmax.f32 %v823_v41, %v824_v60  ;;  %v778_v15 = vmul.f32 %v1438_v42, %v742_v61 }
 0x15d   :  { %v637_v58 = vpop.f32.mrf.mxu0  ;;  %v757_v20 = vmax.f32 %v725_v7, 0.0  ;;  %v863_v26 = vrot.slane %v862_v5, 1  ;;  %v1492_v28 = vmax.f32 %v867_v0, %v868_v12  ;;  %v819_v9 = vrot.slane %v818_v53, 2 }
 0x15e   :  { %v671_v59 = vpop.f32.mrf.mxu1  ;;  %v744_v11 = vmax.f32 %v712_v22, 0.0  ;;  %v713_v44 = vadd.f32 %v1429_v30, %v637_v58  ;;  %v779_v4 = vmul.f32 %v1449_v50, %v743_v1  ;;  %v791_v63 = vmul.f32 %v1449_v50, %v755_v10 }
 0x15f   :  { %v726_v23 = vadd.f32 %v1427_v29, %v671_v59  ;;  %v826_v31 = vrot.slane %v825_v14, 2  ;;  %v792_v32 = vmul.f32 %v1443_v43, %v756_v13  ;;  %v793_v38 = vmul.f32 %v1455_v54, %v757_v20 }
 0x160   :  { %v673_v8 = vpop.f32.mrf.mxu1  ;;  %v780_v16 = vmul.f32 %v1443_v43, %v744_v11  ;;  %v745_v17 = vmax.f32 %v713_v44, 0.0  ;;  %v1500_v51 = vmax.f32 %v813_v3, %v814_v21  ;;  %v1502_v52 = vmax.f32 %v862_v5, %v863_v26 }
 0x161   :  { %v727_v24 = vadd.f32 %v1429_v30, %v673_v8  ;;  %v758_v41 = vmax.f32 %v726_v23, 0.0  ;;  %v820_v2 = vmax.f32 %v818_v53, %v819_v9  ;;  %v827_v57 = vmax.f32 %v825_v14, %v826_v31 }
 0x162   :  { %v675_v27 = vpop.f32.mrf.mxu1  ;;  %v830_v18 = vmax.f32 %v778_v15, %v780_v16  ;;  %v781_v36 = vmul.f32 %v1455_v54, %v745_v17  ;;  %v872_v58 = vmax.f32 %v790_v6, %v792_v32  ;;  %v879_v61 = vmax.f32 %v791_v63, %v793_v38 }
 0x163   :  { %v641_v39 = vpop.f32.mrf.mxu0  ;;  %v728_v34 = vadd.f32 %v1427_v29, %v675_v27  ;;  %v759_v47 = vmax.f32 %v727_v24, 0.0  ;;  %v794_v62 = vmul.f32 %v1438_v42, %v758_v41  ;;  %v870_v44 = vrot.slane %v1492_v28, 1 }
 0x164   :  { %v677_v25 = vpop.f32.mrf.mxu1  ;;  %v837_v33 = vmax.f32 %v779_v4, %v781_v36  ;;  %v831_v40 = vrot.slane %v830_v18, 4  ;;  %v714_v49 = vadd.f32 %v1427_v29, %v641_v39  ;;  %v821_v53 = vrot.slane %v820_v2, 1 }
 0x165   :  { %v643_v37 = vpop.f32.mrf.mxu0  ;;  %v729_v45 = vadd.f32 %v1429_v30, %v677_v25  ;;  %v760_v48 = vmax.f32 %v728_v34, 0.0  ;;  %v795_v10 = vmul.f32 %v1449_v50, %v759_v47  ;;  %v873_v13 = vrot.slane %v872_v58, 4 }
 0x166   :  { %v838_v46 = vrot.slane %v837_v33, 4  ;;  %v715_v0 = vadd.f32 %v1429_v30, %v643_v37  ;;  %v832_v22 = vmax.f32 %v830_v18, %v831_v40  ;;  %v746_v1 = vmax.f32 %v714_v49, 0.0 }
 0x167   :  { %v645_v35 = vpop.f32.mrf.mxu0  ;;  %v761_v55 = vmax.f32 %v729_v45, 0.0  ;;  %v796_v59 = vmul.f32 %v1443_v43, %v760_v48  ;;  %v828_v16 = vrot.slane %v827_v57, 1  ;;  %v880_v17 = vrot.slane %v879_v61, 4 }
 0x168   :  { %v839_v8 = vmax.f32 %v837_v33, %v838_v46  ;;  %v716_v11 = vadd.f32 %v1427_v29, %v645_v35  ;;  %v747_v6 = vmax.f32 %v715_v0, 0.0  ;;  %v833_v39 = vrot.slane %v832_v22, 2 }
 0x169   :  { %v647_v60 = vpop.f32.mrf.mxu0  ;;  %v797_v7 = vmul.f32 %v1455_v54, %v761_v55  ;;  %v886_v5 = vmax.f32 %v794_v62, %v796_v59  ;;  %v782_v23 = vmul.f32 %v1438_v42, %v746_v1  ;;  %v822_v26 = vmax.f32 %v820_v2, %v821_v53 }
 0x16a   :  { %v681_v56 = vpop.f32.mrf.mxu1  ;;  %v717_v12 = vadd.f32 %v1429_v30, %v647_v60  ;;  %v748_v14 = vmax.f32 %v716_v11, 0.0  ;;  %v840_v20 = vrot.slane %v839_v8, 2  ;;  %v783_v24 = vmul.f32 %v1449_v50, %v747_v6 }
 0x16b   :  { %v893_v27 = vmax.f32 %v795_v10, %v797_v7  ;;  %v730_v18 = vadd.f32 %v1427_v29, %v681_v56  ;;  %v887_v36 = vrot.slane %v886_v5, 4  ;;  %v874_v9 = vmax.f32 %v872_v58, %v873_v13 }
 0x16c   :  { %v683_v3 = vpop.f32.mrf.mxu1  ;;  %v749_v21 = vmax.f32 %v717_v12, 0.0  ;;  %v784_v4 = vmul.f32 %v1443_v43, %v748_v14  ;;  %v829_v33 = vmax.f32 %v827_v57, %v828_v16  ;;  %v881_v34 = vmax.f32 %v879_v61, %v880_v17 }
 0x16d   :  { %v731_v37 = vadd.f32 %v1429_v30, %v683_v3  ;;  %v894_v63 = vrot.slane %v893_v27, 4  ;;  %v834_v35 = vmax.f32 %v832_v22, %v833_v39  ;;  %v841_v40 = vmax.f32 %v839_v8, %v840_v20 }
 0x16e   :  { %v685_v15 = vpop.f32.mrf.mxu1  ;;  %v785_v25 = vmul.f32 %v1455_v54, %v749_v21  ;;  %v844_v31 = vmax.f32 %v782_v23, %v784_v4  ;;  %v762_v45 = vmax.f32 %v730_v18, 0.0  ;;  %v888_v47 = vmax.f32 %v886_v5, %v887_v36 }
 0x16f   :  { %v732_v46 = vadd.f32 %v1427_v29, %v685_v15  ;;  %v763_v49 = vmax.f32 %v731_v37, 0.0  ;;  %v875_v0 = vrot.slane %v874_v9, 2  ;;  %v895_v56 = vmax.f32 %v893_v27, %v894_v63 }
 0x170   :  { %v687_v32 = vpop.f32.mrf.mxu1  ;;  %v851_v38 = vmax.f32 %v783_v24, %v785_v25  ;;  %v845_v41 = vrot.slane %v844_v31, 4  ;;  %v882_v58 = vrot.slane %v881_v34, 2  ;;  %v835_v59 = vrot.slane %v834_v35, 1 }
 0x171   :  { %v733_v55 = vadd.f32 %v1429_v30, %v687_v32  ;;  %v764_v57 = vmax.f32 %v732_v46, 0.0  ;;  %v842_v22 = vrot.slane %v841_v40, 1  ;;  %v798_v7 = vmul.f32 %v1438_v42, %v762_v45 }
 0x172   :  { %v852_v48 = vrot.slane %v851_v38, 4  ;;  %v846_v2 = vmax.f32 %v844_v31, %v845_v41  ;;  %v889_v3 = vrot.slane %v888_v47, 2  ;;  %v799_v10 = vmul.f32 %v1449_v50, %v763_v49 }
 0x173   :  { %v765_v61 = vmax.f32 %v733_v55, 0.0  ;;  %v800_v29 = vmul.f32 %v1443_v43, %v764_v57  ;;  %v876_v1 = vmax.f32 %v874_v9, %v875_v0  ;;  %v896_v11 = vrot.slane %v895_v56, 2 }
 0x174   :  { %v853_v60 = vmax.f32 %v851_v38, %v852_v48  ;;  %v847_v62 = vrot.slane %v846_v2, 2  ;;  %v883_v12 = vmax.f32 %v881_v34, %v882_v58  ;;  %v836_v53 = vmax.f32 %v834_v35, %v835_v59 }
 0x175   :  { %v801_v30 = vmul.f32 %v1455_v54, %v765_v61  ;;  %v900_v6 = vmax.f32 %v798_v7, %v800_v29  ;;  %v931_v42 = vsel %vm930_vm7, %v822_v26, %v1486_v19  ;;  %v843_v14 = vmax.f32 %v841_v40, %v842_v22 }
 0x176   :  { %v854_v8 = vrot.slane %v853_v60, 2  ;;  %v848_v5 = vmax.f32 %v846_v2, %v847_v62  ;;  %v944_v50 = vsel %vm930_vm7, %v829_v33, %v1500_v51  ;;  %v890_v16 = vmax.f32 %v888_v47, %v889_v3 }
 0x177   :  { %v907_v27 = vmax.f32 %v799_v10, %v801_v30  ;;  %v901_v15 = vrot.slane %v900_v6, 4  ;;  %v877_v39 = vrot.slane %v876_v1, 1  ;;  %v897_v21 = vmax.f32 %v895_v56, %v896_v11 }
 0x178   :  { %v855_v13 = vmax.f32 %v853_v60, %v854_v8  ;;  %v849_v43 = vrot.slane %v848_v5, 1  ;;  %v884_v4 = vrot.slane %v883_v12, 1  ;;  %v933_v18 = vsel %vm932_vm8, %v836_v53, %v931_v42 }
 0x179   :  { %v908_v54 = vrot.slane %v907_v27, 4  ;;  %v902_v23 = vmax.f32 %v900_v6, %v901_v15  ;;  %v871_v19 = vmax.f32 %v1492_v28, %v870_v44  ;;  %v945_v25 = vsel %vm932_vm8, %v843_v14, %v944_v50 }
 0x17a   :  { %v856_v17 = vrot.slane %v855_v13, 1  ;;  %v850_v20 = vmax.f32 %v848_v5, %v849_v43  ;;  %v891_v26 = vrot.slane %v890_v16, 1  ;;  %v878_v32 = vmax.f32 %v876_v1, %v877_v39 }
 0x17b   :  { %v909_v24 = vmax.f32 %v907_v27, %v908_v54  ;;  %v903_v37 = vrot.slane %v902_v23, 2  ;;  %v898_v33 = vrot.slane %v897_v21, 1  ;;  %v885_v38 = vmax.f32 %v883_v12, %v884_v4 }
 0x17c   :  { %v857_v36 = vmax.f32 %v855_v13, %v856_v17  ;;  %v935_v51 = vsel %vm934_vm9, %v850_v20, %v933_v18  ;;  %v892_v41 = vmax.f32 %v890_v16, %v891_v26 }
 0x17d   :  { %v937_v9 = vsel %vm936_vm10, %v1502_v52, %v935_v51  ;;  %v910_v31 = vrot.slane %v909_v24, 2  ;;  %v904_v35 = vmax.f32 %v902_v23, %v903_v37  ;;  %v899_v52 = vmax.f32 %v897_v21, %v898_v33 }
 0x17e   :  { %v946_v63 = vsel %vm934_vm9, %v857_v36, %v945_v25  ;;  %v939_v44 = vsel %vm938_vm11, %v878_v32, %v937_v9 }
 0x17f   :  { %v947_v34 = vsel %vm936_vm10, %v871_v19, %v946_v63  ;;  %v911_v40 = vmax.f32 %v909_v24, %v910_v31  ;;  %v905_v28 = vrot.slane %v904_v35, 1  ;;  %v941_v48 = vsel %vm940_vm12, %v892_v41, %v939_v44 }
 0x180   :  { %v948_v46 = vsel %vm938_vm11, %v885_v38, %v947_v34 }
 0x181   :  { %v912_v45 = vrot.slane %v911_v40, 1  ;;  %v906_v47 = vmax.f32 %v904_v35, %v905_v28  ;;  %v949_v0 = vsel %vm940_vm12, %v899_v52, %v948_v46 }
 0x183   :  { %v913_v49 = vmax.f32 %v911_v40, %v912_v45  ;;  %v943_v55 = vsel %vm942_vm13, %v906_v47, %v941_v48 }
 0x184   :  { %953 = vst [vmem:[%s1550_s4] sm:$0xff] %v943_v55 }
 0x185   :  { %v950_v56 = vsel %vm942_vm13, %v913_v49, %v949_v0 }
 0x186   :  { %954 = vst [vmem:[%s1550_s4 + $0x8] sm:$0xff] %v950_v56 }

// kernel: cl4ljp_forward.7
= control target key start
LH: loop header
LB: loop body
LE: loop exit
PB: predicated region body
PF: predicated region fallthrough
CT: control target
= control target key end

     0   :  { %s1149_s15 = smov 0   ;;  %s1480_s0 = inlined_call_operand.vmem [shape: bf16[24,20,32], index: 0, kind: input, shape index: {}]   ;;  %s1481_s1 = inlined_call_operand.vmem [shape: bf16[160,128], index: 1, kind: input, shape index: {}]   ;;  %s1482_s2 = inlined_call_operand.vmem [shape: f32[1,128], index: 2, kind: input, shape index: {}]   ;;  %s1483_s3 = inlined_call_operand.vmem [shape: f32[16,128], index: 3, kind: input, shape index: {}]   ;;  %s1484_s4 = inlined_call_operand.vmem [shape: f32[24,128], index: 4, kind: output, shape index: {}]  }
   0x1 LB: > { %s1155_s16 = sadd.s32 4294967295, %s1118_s15   ;;  %p1012_p0 = scmp.ge.s32.totalorder %s1118_s15, 1  ;;  %s1118_s15 = sphi %s1149_s15, %s14_s15  }
   0x2   : > { %p164_p1 = scmp.lt.s32.totalorder %s1118_s15, 4 }
   0x4   : > { %p165_p2 = pnand %p1012_p0, %p164_p1 }
   0x5   : > { %s1013_s17 = sshll.u32 (!%p165_p2), %s1155_s16, 3  ;;  %s1121_s30 = smov (!%p165_p2), 64  }
   0x6   : > { %168 = sbr.rel (%p165_p2) target bundleno = 402 (0x192), region = 36  ;;  %p191_p3 = scmp.lt.s32.totalorder (!%p165_p2), %s1013_s17, 23 }
   0x7   : > { %s1122_s9 = smov (!%p165_p2), 96   ;;  %s1123_s10 = smov (!%p165_p2), 32  }
   0x8   : > { %p197_p4 = scmp.lt.s32.totalorder (!%p165_p2), %s1155_s16, 2 }
   0xb   : > { %v1120_v0 = vmov 0   ;;  %v1102_v1 = vld [vmem:[%s1481_s1 + $0x38] sm:$0xff]   ;;  %s1486_s17 = smov (!%p191_p3, %s1013_s17), 23  ;;  %v1103_v2 = vld [vmem:[%s1481_s1 + $0x30] sm:$0xff]   ;;  %vm403_vm0 = vcmask 1046528   ;;  %v1104_v3 = vld [vmem:[%s1481_s1 + $0x28] sm:$0xff]  }
   0xc   : > { %721 = vmatprep.subr.bf16.mxu0 %v1120_v0  ;;  %1053 = vmatprep.subr.bf16.mxu1 %v1120_v0  ;;  %s1073_s22 = smul.u32 12, %s1486_s17  ;;  %vm444_vm1 = vsmask.f32 6400  ;;  %vm290_vm2 = vsmask.f32 7424  ;;  %v1105_v7 = vld [vmem:[%s1481_s1 + $0x20] sm:$0xff]  }
   0xd   : > { %722 = vmatpush1.bf16.msra.mxu0 %v1102_v1  ;;  %1063 = vmatpush1.bf16.msra.mxu1 %v1102_v1  ;;  %v1106_v25 = vld [vmem:[%s1481_s1 + $0x18] sm:$0xff]   ;;  %v1107_v39 = vld [vmem:[%s1481_s1 + $0x10] sm:$0xff]   ;;  %vm558_vm3 = vcmask 261120   ;;  %vm533_vm4 = vcmask 1045504   ;;  %vm575_vm5 = vcmask 523264   ;;  %vm592_vm6 = vcmask 785408  }
   0xe   : > { %723 = vmatprep.subr.bf16.mxu0 %v1120_v0  ;;  %1054 = vmatprep.subr.bf16.mxu1 %v1120_v0  ;;  %s1173_s25 = scalar_lea.vmem %s1480_s0, %s1073_s22  ;;  %vm939_vm7 = vcmask 1041409   ;;  %vm941_vm8 = vcmask 1042434   ;;  %vm943_vm9 = vcmask 1043459   ;;  %s1488_s16 = smov (!%p197_p4, %s1155_s16), 2  ;;  %vm945_vm10 = vcmask 1044484  }
   0xf   : > { %v1179_v4 = vld [vmem:[%s1173_s25 + $0xc] sm:$0xff]   ;;  %v1182_v5 = vld [vmem:[%s1173_s25 + $0x14] ss:$0 sps:$4 sm:$0x33]   ;;  %v1187_v6 = vld [vmem:[%s1173_s25] sm:$0xff]   ;;  %vm947_vm11 = vcmask 1045509  }
  0x10   : > { %v407_v8 = vrot.slane %v1179_v4, 1  ;;  %v408_v9 = vrot.slane %v1182_v5, 1  ;;  %v1195_v10 = vld [vmem:[%s1173_s25 + $0x8] ss:$0 sps:$4 sm:$0x33]   ;;  %v1198_v11 = vld [vmem:[%s1173_s25 + $0x30] sm:$0xff]  }
  0x11   : > { %724 = vmatpush1.bf16.msra.mxu0 %v1103_v2  ;;  %1064 = vmatpush1.bf16.msra.mxu1 %v1103_v2  ;;  %v404_v12 = vrot.slane %v1187_v6, 1  ;;  %v292_v13 = vshrl.u32 %v1187_v6, 16  ;;  %v405_v15 = vrot.slane %v1195_v10, 1  ;;  %v1205_v16 = vld [vmem:[%s1173_s25 + $0x38] ss:$0 sps:$4 sm:$0x33]  }
  0x12   : > { %725 = vmatprep.subr.bf16.mxu0 %v1120_v0  ;;  %1055 = vmatprep.subr.bf16.mxu1 %v1120_v0  ;;  %v409_v14 = vsel %vm403_vm0, %v407_v8, %v408_v9  ;;  %v416_v17 = vrot.slane %v1198_v11, 1  ;;  %v294_v18 = vshll.u32 %v1187_v6, 16  ;;  %v299_v19 = vshll.u32 %v1195_v10, 16  ;;  %v1226_v38 = vld [vmem:[%s1173_s25 + $0x3c] sm:$0xff]   ;;  %s1015_s27 = sshll.u32 %s1488_s16, 3 }
  0x13   : > { %430 = vrot.lane.b32.xlu1 %v409_v14, %s1121_s30  ;;  %v445_v20 = vrot.slane %v292_v13, 1  ;;  %v406_v21 = vsel %vm403_vm0, %v404_v12, %v405_v15  ;;  %v417_v22 = vrot.slane %v1205_v16, 1  ;;  %v448_v23 = vshrl.u32 %v1195_v10, 16  ;;  %v1237_v48 = vld [vmem:[%s1173_s25 + $0x44] ss:$0 sps:$4 sm:$0x33]  }
  0x14   : > { %v340_v24 = vshrl.u32 %v1198_v11, 16  ;;  %428 = vrot.lane.b32.xlu0 %v406_v21, %s1121_s30  ;;  %v446_v26 = vrot.slane %v294_v18, 2  ;;  %v451_v27 = vrot.slane %v299_v19, 2  ;;  %v342_v28 = vshll.u32 %v1198_v11, 16  ;;  %v1251_v2 = vld [vmem:[%s1173_s25 + $0x18] sm:$0xff]  }
  0x15   : > { %726 = vmatpush1.bf16.msra.mxu0 %v1104_v3  ;;  %1065 = vmatpush1.bf16.msra.mxu1 %v1104_v3  ;;  %v347_v29 = vshll.u32 %v1205_v16, 16  ;;  %v418_v30 = vsel %vm403_vm0, %v416_v17, %v417_v22  ;;  %v450_v31 = vrot.slane %v448_v23, 1  ;;  %v296_v32 = vrot.slane %v294_v18, 1  ;;  %v1261_v17 = vld [vmem:[%s1173_s25 + $0x20] ss:$0 sps:$4 sm:$0x33]  }
  0x16   : > { %727 = vmatprep.subr.bf16.mxu0 %v1120_v0  ;;  %1056 = vmatprep.subr.bf16.mxu1 %v1120_v0  ;;  %v301_v33 = vrot.slane %v299_v19, 1  ;;  %v447_v34 = vor.u32 %v446_v26, %v445_v20  ;;  %v344_v35 = vrot.slane %v342_v28, 1  ;;  %v481_v37 = vrot.slane %v340_v24, 1  ;;  %v1108_v22 = vld [vmem:[%s1481_s1 + $0x8] sm:$0xff]  }
  0x17   : > { %v349_v36 = vrot.slane %v347_v29, 1  ;;  %v452_v40 = vor.u32 %v451_v27, %v450_v31  ;;  %v297_v41 = vor.u32 %v296_v32, %v292_v13  ;;  %v482_v42 = vrot.slane %v342_v28, 2  ;;  %v1109_v31 = vld [vmem:[%s1481_s1] sm:$0xff]  }
  0x18   : > { %v484_v43 = vshrl.u32 %v1205_v16, 16  ;;  %436 = vrot.lane.b32.xlu0 %v418_v30, %s1121_s30  ;;  %v345_v44 = vor.u32 %v344_v35, %v340_v24  ;;  %v487_v45 = vrot.slane %v347_v29, 2  ;;  %v304_v46 = vshrl.u32 %v1179_v4, 16  ;;  %v1273_v30 = vld [vmem:[%s1173_s25 + $0x50] ss:$0 sps:$4 sm:$0x33]  }
  0x19   : > { %728 = vmatpush1.bf16.msra.mxu0 %v1105_v7  ;;  %1066 = vmatpush1.bf16.msra.mxu1 %v1105_v7  ;;  %v306_v47 = vshll.u32 %v1179_v4, 16  ;;  %v453_v49 = vsel %vm444_vm1, %v447_v34, %v452_v40  ;;  %v302_v50 = vsel %vm290_vm2, %v297_v41, %v301_v33  ;;  %v483_v51 = vor.u32 %v482_v42, %v481_v37 }
  0x1a   : > { %729 = vmatprep.subr.bf16.mxu0 %v1120_v0  ;;  %1057 = vmatprep.subr.bf16.mxu1 %v1120_v0  ;;  %v486_v52 = vrot.slane %v484_v43, 1  ;;  %v350_v53 = vsel %vm290_vm2, %v345_v44, %v349_v36  ;;  %v311_v55 = vshll.u32 %v1182_v5, 16  ;;  %v454_v56 = vrot.slane %v304_v46, 1  ;;  %v1283_v36 = vld [vmem:[%s1173_s25 + $0x48] sm:$0xff]  }
  0x1b   : > { %517 = vrot.lane.b32.xlu1 %v453_v49, %s1122_s9  ;;  %v308_v54 = vrot.slane %v306_v47, 1  ;;  %v455_v58 = vrot.slane %v306_v47, 2  ;;  %v457_v59 = vshrl.u32 %v1182_v5, 16  ;;  %v352_v60 = vshrl.u32 %v1226_v38, 16 }
  0x1c   : > { %v488_v57 = vor.u32 %v487_v45, %v486_v52  ;;  %387 = vrot.lane.b32.xlu0 %v302_v50, %s1123_s10  ;;  %v313_v62 = vrot.slane %v311_v55, 1  ;;  %v460_v63 = vrot.slane %v311_v55, 2  ;;  %v354_v1 = vshll.u32 %v1226_v38, 16  ;;  %v1291_v45 = vld [vmem:[%s1173_s25 + $0x24] sm:$0xff]  }
  0x1d   : > { %730 = vmatpush1.bf16.msra.mxu0 %v1106_v25  ;;  %1067 = vmatpush1.bf16.msra.mxu1 %v1106_v25  ;;  %v309_v61 = vor.u32 %v308_v54, %v304_v46  ;;  %v456_v7 = vor.u32 %v455_v58, %v454_v56  ;;  %v459_v8 = vrot.slane %v457_v59, 1  ;;  %v359_v9 = vshll.u32 %v1237_v48, 16  ;;  %v1110_v50 = vld [vmem:[%s1481_s1 + $0x48] sm:$0xff]  }
  0x1e   : > { %731 = vmatprep.subr.bf16.mxu0 %v1120_v0  ;;  %1058 = vmatprep.subr.bf16.mxu1 %v1120_v0  ;;  %v489_v3 = vsel %vm444_vm1, %v483_v51, %v488_v57  ;;  %v356_v13 = vrot.slane %v354_v1, 1  ;;  %v419_v14 = vrot.slane %v1226_v38, 1  ;;  %v420_v15 = vrot.slane %v1237_v48, 1  ;;  %v1305_v58 = vld [vmem:[%s1173_s25 + $0x2c] ss:$0 sps:$4 sm:$0x33]  }
  0x1f   : > { %395 = vrot.lane.b32.xlu1 %v350_v53, %s1123_s10  ;;  %v314_v12 = vsel %vm290_vm2, %v309_v61, %v313_v62  ;;  %v461_v18 = vor.u32 %v460_v63, %v459_v8  ;;  %v361_v19 = vrot.slane %v359_v9, 1  ;;  %v490_v20 = vrot.slane %v352_v60, 1  ;;  %v1111_v8 = vld [vmem:[%s1481_s1 + $0x40] sm:$0xff]  }
  0x20   : > { %v491_v21 = vrot.slane %v354_v1, 2  ;;  %389 = vrot.lane.b32.xlu0 %v314_v12, %s1123_s10  ;;  %v357_v23 = vor.u32 %v356_v13, %v352_v60  ;;  %v493_v24 = vshrl.u32 %v1237_v48, 16  ;;  %v496_v25 = vrot.slane %v359_v9, 2 }
  0x21   : > { %732 = vmatpush1.bf16.msra.mxu0 %v1107_v39  ;;  %1068 = vmatpush1.bf16.msra.mxu1 %v1107_v39  ;;  %v462_v26 = vsel %vm444_vm1, %v456_v7, %v461_v18  ;;  %v316_v28 = vshrl.u32 %v1251_v2, 16  ;;  %v318_v29 = vshll.u32 %v1251_v2, 16  ;;  %v323_v34 = vshll.u32 %v1261_v17, 16 }
  0x22   : > { %733 = vmatprep.subr.bf16.mxu0 %v1120_v0  ;;  %1059 = vmatprep.subr.bf16.mxu1 %v1120_v0  ;;  %v492_v27 = vor.u32 %v491_v21, %v490_v20  ;;  %v362_v32 = vsel %vm290_vm2, %v357_v23, %v361_v19  ;;  %v495_v33 = vrot.slane %v493_v24, 1  ;;  %v410_v35 = vrot.slane %v1251_v2, 1  ;;  %v1323_v21 = vld [vmem:[%s1173_s25 + $0x54] sm:$0xff]  }
  0x23   : > { %525 = vrot.lane.b32.xlu1 %v489_v3, %s1122_s9  ;;  %v320_v37 = vrot.slane %v318_v29, 1  ;;  %v411_v39 = vrot.slane %v1261_v17, 1  ;;  %v463_v40 = vrot.slane %v316_v28, 1  ;;  %v464_v41 = vrot.slane %v318_v29, 2 }
  0x24   : > { %519 = vrot.lane.b32.xlu0 %v462_v26, %s1122_s9  ;;  %v497_v42 = vor.u32 %v496_v25, %v495_v33  ;;  %v466_v43 = vshrl.u32 %v1261_v17, 16  ;;  %v469_v44 = vrot.slane %v323_v34, 2  ;;  %v421_v46 = vsel %vm403_vm0, %v419_v14, %v420_v15  ;;  %v1330_v26 = vld [vmem:[%s1173_s25 + $0x5c] ss:$0 sps:$4 sm:$0x33]  }
  0x25   : > { %734 = vmatpush1.bf16.msra.mxu0 %v1108_v22  ;;  %1069 = vmatpush1.bf16.msra.mxu1 %v1108_v22  ;;  %v321_v47 = vor.u32 %v320_v37, %v316_v28  ;;  %v325_v49 = vrot.slane %v323_v34, 1  ;;  %v364_v52 = vshrl.u32 %v1283_v36, 16  ;;  %v366_v53 = vshll.u32 %v1283_v36, 16 }
  0x26   : > { %735 = vmatprep.subr.bf16.mxu0 %v1120_v0  ;;  %1060 = vmatprep.subr.bf16.mxu1 %v1120_v0  ;;  %v468_v51 = vrot.slane %v466_v43, 1  ;;  %v371_v54 = vshll.u32 %v1273_v30, 16  ;;  %v498_v55 = vsel %vm444_vm1, %v492_v27, %v497_v42  ;;  %v412_v56 = vsel %vm403_vm0, %v410_v35, %v411_v39 }
  0x27   : > { %397 = vrot.lane.b32.xlu1 %v362_v32, %s1123_s10  ;;  %v465_v57 = vor.u32 %v464_v41, %v463_v40  ;;  %v368_v60 = vrot.slane %v366_v53, 1  ;;  %v499_v61 = vrot.slane %v364_v52, 1  ;;  %v500_v62 = vrot.slane %v366_v53, 2 }
  0x28   : > { %438 = vrot.lane.b32.xlu0 %v421_v46, %s1121_s30  ;;  %v470_v59 = vor.u32 %v469_v44, %v468_v51  ;;  %v326_v63 = vsel %vm290_vm2, %v321_v47, %v325_v49  ;;  %v422_v1 = vrot.slane %v1283_v36, 1  ;;  %v502_v3 = vshrl.u32 %v1273_v30, 16 }
  0x29   : > { %736 = vmatpush1.bf16.msra.mxu0 %v1109_v31  ;;  %1070 = vmatpush1.bf16.msra.mxu1 %v1109_v31  ;;  %v505_v7 = vrot.slane %v371_v54, 2  ;;  %v373_v9 = vrot.slane %v371_v54, 1  ;;  %v423_v12 = vrot.slane %v1273_v30, 1  ;;  %v328_v13 = vshrl.u32 %v1291_v45, 16 }
  0x2a   : > { %749 = vmatprep.subr.bf16.mxu0 %v1120_v0  ;;  %1061 = vmatprep.subr.bf16.mxu1 %v1120_v0  ;;  %v330_v14 = vshll.u32 %v1291_v45, 16  ;;  %v471_v15 = vsel %vm444_vm1, %v465_v57, %v470_v59  ;;  %v369_v18 = vor.u32 %v368_v60, %v364_v52  ;;  %v504_v19 = vrot.slane %v502_v3, 1 }
  0x2b   : > { %527 = vrot.lane.b32.xlu1 %v498_v55, %s1122_s9  ;;  %v335_v20 = vshll.u32 %v1305_v58, 16  ;;  %v501_v22 = vor.u32 %v500_v62, %v499_v61  ;;  %v413_v24 = vrot.slane %v1291_v45, 1  ;;  %v414_v25 = vrot.slane %v1305_v58, 1 }
  0x2c   : > { %391 = vrot.lane.b32.xlu0 %v326_v63, %s1123_s10  ;;  %v332_v23 = vrot.slane %v330_v14, 1  ;;  %v506_v27 = vor.u32 %v505_v7, %v504_v19  ;;  %v472_v28 = vrot.slane %v328_v13, 1  ;;  %v473_v29 = vrot.slane %v330_v14, 2 }
  0x2d   : > { %750 = vmatpush2.bf16.msra.mxu0 %v1110_v50  ;;  %1071 = vmatpush2.bf16.msra.mxu1 %v1110_v50  ;;  %v475_v31 = vshrl.u32 %v1305_v58, 16  ;;  %v337_v32 = vrot.slane %v335_v20, 1  ;;  %v374_v33 = vsel %vm290_vm2, %v369_v18, %v373_v9  ;;  %v478_v35 = vrot.slane %v335_v20, 2 }
  0x2e   : > { %751 = vmatprep.subr.bf16.mxu0 %v1120_v0  ;;  %1062 = vmatprep.subr.bf16.mxu1 %v1120_v0  ;;  %v333_v0 = vor.u32 %v332_v23, %v328_v13  ;;  %v378_v37 = vshll.u32 %v1323_v21, 16  ;;  %v424_v39 = vsel %vm403_vm0, %v422_v1, %v423_v12  ;;  %v415_v40 = vsel %vm403_vm0, %v413_v24, %v414_v25 }
  0x2f   : > { %432 = vrot.lane.b32.xlu1 %v412_v56, %s1121_s30  ;;  %v477_v34 = vrot.slane %v475_v31, 1  ;;  %v383_v41 = vshll.u32 %v1330_v26, 16  ;;  %v507_v42 = vsel %vm444_vm1, %v501_v22, %v506_v27  ;;  %v474_v43 = vor.u32 %v473_v29, %v472_v28 }
  0x30   : > { %521 = vrot.lane.b32.xlu0 %v471_v15, %s1122_s9  ;;  %v376_v44 = vshrl.u32 %v1323_v21, 16  ;;  %v380_v46 = vrot.slane %v378_v37, 1  ;;  %v338_v47 = vsel %vm290_vm2, %v333_v0, %v337_v32  ;;  %v425_v49 = vrot.slane %v1323_v21, 1 }
  0x31   : > { %752 = vmatpush2.bf16.msra.mxu0 %v1111_v8  ;;  %1072 = vmatpush2.bf16.msra.mxu1 %v1111_v8  ;;  %v426_v50 = vrot.slane %v1330_v26, 1  ;;  %v511_v51 = vshrl.u32 %v1330_v26, 16  ;;  %v479_v52 = vor.u32 %v478_v35, %v477_v34  ;;  %v534_v54 = vrot.slane %v1187_v6, 2 }
  0x32   : > { %v508_v53 = vrot.slane %v376_v44, 1  ;;  %v385_v55 = vrot.slane %v383_v41, 1  ;;  %v509_v56 = vrot.slane %v378_v37, 2  ;;  %v514_v57 = vrot.slane %v383_v41, 2 }
  0x33   : > { %399 = vrot.lane.b32.xlu1 %v374_v33, %s1123_s10  ;;  %v535_v59 = vrot.slane %v1195_v10, 2  ;;  %v381_v60 = vor.u32 %v380_v46, %v376_v44  ;;  %v546_v61 = vrot.slane %v1198_v11, 2  ;;  %v547_v62 = vrot.slane %v1205_v16, 2 }
  0x34   : > { %440 = vrot.lane.b32.xlu0 %v424_v39, %s1121_s30  ;;  %v537_v63 = vrot.slane %v1179_v4, 2  ;;  %v513_v1 = vrot.slane %v511_v51, 1  ;;  %v538_v7 = vrot.slane %v1182_v5, 2  ;;  %v549_v8 = vrot.slane %v1226_v38, 2 }
  0x35   : > { %v536_v3 = vsel %vm533_vm4, %v534_v54, %v535_v59  ;;  %v548_v10 = vsel %vm533_vm4, %v546_v61, %v547_v62  ;;  %v550_v9 = vrot.slane %v1237_v48, 2  ;;  %v540_v12 = vrot.slane %v1251_v2, 2 }
  0x36   : > { %1042 = vmatprep.mubr.msk.bf16.mxu0 %vm558_vm3, %v536_v3  ;;  %v541_v16 = vrot.slane %v1261_v17, 2  ;;  %v480_v13 = vsel %vm444_vm1, %v474_v43, %v479_v52  ;;  %1046 = vmatprep.mubr.msk.bf16.mxu1 %vm558_vm3, %v548_v10  ;;  %v539_v5 = vsel %vm533_vm4, %v537_v63, %v538_v7  ;;  %v552_v14 = vrot.slane %v1283_v36, 2 }
  0x37   : > { %529 = vrot.lane.b32.xlu1 %v507_v42, %s1122_s9  ;;  %v553_v15 = vrot.slane %v1273_v30, 2  ;;  %v551_v18 = vsel %vm533_vm4, %v549_v8, %v550_v9  ;;  %v543_v19 = vrot.slane %v1291_v45, 2  ;;  %v544_v17 = vrot.slane %v1305_v58, 2 }
  0x38   : > { %393 = vrot.lane.b32.xlu0 %v338_v47, %s1123_s10  ;;  %v542_v48 = vsel %vm533_vm4, %v540_v12, %v541_v16  ;;  %v555_v22 = vrot.slane %v1323_v21, 2  ;;  %v556_v23 = vrot.slane %v1330_v26, 2  ;;  %v386_v24 = vsel %vm290_vm2, %v381_v60, %v385_v55 }
  0x39   : > { %v554_v20 = vsel %vm533_vm4, %v552_v14, %v553_v15  ;;  %v510_v25 = vor.u32 %v509_v56, %v508_v53  ;;  %v515_v30 = vor.u32 %v514_v57, %v513_v1  ;;  %v545_v27 = vsel %vm533_vm4, %v543_v19, %v544_v17 }
  0x3a   : > { %v557_v28 = vsel %vm533_vm4, %v555_v22, %v556_v23  ;;  %v427_v58 = vsel %vm403_vm0, %v425_v49, %v426_v50  ;;  %vm949_vm12 = vcmask 1046534   ;;  %vm951_vm13 = vcmask 1047559  }
  0x3b   : > { %434 = vrot.lane.b32.xlu1 %v415_v40, %s1121_s30  ;;  %v516_v29 = vsel %vm444_vm1, %v510_v25, %v515_v30 }
  0x3c   : > { %523 = vrot.lane.b32.xlu0 %v480_v13, %s1122_s9 }
  0x3f   : > { %401 = vrot.lane.b32.xlu1 %v386_v24, %s1123_s10 }
  0x40   : > { %442 = vrot.lane.b32.xlu0 %v427_v58, %s1121_s30  ;;  %s200_s30 = scalar_lea.vmem %s1484_s4, %s1015_s27 }
  0x43   : > { %531 = vrot.lane.b32.xlu1 %v516_v29, %s1122_s9 }
  0x85   : > { %v431_v26 = vpop.permute.xlu1 %430 }
  0x86   : > { %v429_v31 = vpop.permute.xlu0 %428 }
  0x8a   : > { %v437_v0 = vpop.permute.xlu0 %436 }
  0x8d   : > { %v518_v32 = vpop.permute.xlu1 %517 }
  0x8e   : > { %v388_v33 = vpop.permute.xlu0 %387 }
  0x8f   : > { %v560_v34 = vsel %vm558_vm3, %v1187_v6, %v388_v33 }
  0x90   : > { %v577_v37 = vsel %vm575_vm5, %v560_v34, %v429_v31 }
  0x91   : > { %v396_v35 = vpop.permute.xlu1 %395  ;;  %v594_v40 = vsel %vm592_vm6, %v577_v37, %v518_v32 }
  0x92   : > { %v568_v39 = vsel %vm558_vm3, %v1198_v11, %v396_v35  ;;  %754 = vmatmul.mubr.bf16.vlgmr.msra.gmra.mxu0 %v594_v40  ;;  %v390_v41 = vpop.permute.xlu0 %389  ;;  %v1436_v40 = vld [vmem:[%s1483_s3 + $0x8] sm:$0xff] }
  0x93   : > { %1043 = vmatprep.mubr.msk.bf16.mxu0 %vm558_vm3, %v539_v5  ;;  %v585_v43 = vsel %vm575_vm5, %v568_v39, %v437_v0  ;;  %v562_v44 = vsel %vm558_vm3, %v1179_v4, %v390_v41 }
  0x94   : > { %v579_v11 = vsel %vm575_vm5, %v562_v44, %v431_v26 }
  0x95   : > { %v526_v42 = vpop.permute.xlu1 %525 }
  0x96   : > { %v606_v6 = vsel %vm592_vm6, %v585_v43, %v526_v42  ;;  %v520_v46 = vpop.permute.xlu0 %519 }
  0x97   : > { %786 = vmatmul.mubr.bf16.vlgmr.msra.gmra.mxu1 %v606_v6  ;;  %v597_v49 = vsel %vm592_vm6, %v579_v11, %v520_v46 }
  0x98   : > { %1047 = vmatprep.mubr.msk.bf16.mxu1 %vm558_vm3, %v551_v18 }
  0x99   : > { %v398_v47 = vpop.permute.xlu1 %397 }
  0x9a   : > { %v570_v50 = vsel %vm558_vm3, %v1226_v38, %v398_v47  ;;  %762 = vmatmul.mubr.bf16.gmra.mxu0 %v597_v49  ;;  %v439_v51 = vpop.permute.xlu0 %438  ;;  %v1444_v47 = vld [vmem:[%s1483_s3] sm:$0xff] }
  0x9b   : > { %v587_v52 = vsel %vm575_vm5, %v570_v50, %v439_v51  ;;  %1044 = vmatprep.mubr.msk.bf16.mxu0 %vm558_vm3, %v542_v48 }
  0x9d   : > { %v528_v4 = vpop.permute.xlu1 %527 }
  0x9e   : > { %v609_v53 = vsel %vm592_vm6, %v587_v52, %v528_v4  ;;  %v392_v54 = vpop.permute.xlu0 %391 }
  0x9f   : > { %794 = vmatmul.mubr.bf16.gmra.mxu1 %v609_v53  ;;  %v564_v55 = vsel %vm558_vm3, %v1251_v2, %v392_v54 }
  0xa0   : > { %1048 = vmatprep.mubr.msk.bf16.mxu1 %vm558_vm3, %v554_v20 }
  0xa1   : > { %v433_v56 = vpop.permute.xlu1 %432 }
  0xa2   : > { %v581_v57 = vsel %vm575_vm5, %v564_v55, %v433_v56  ;;  %v522_v38 = vpop.permute.xlu0 %521 }
  0xa3   : > { %v600_v59 = vsel %vm592_vm6, %v581_v57, %v522_v38 }
  0xa4   : > { %770 = vmatmul.mubr.bf16.gmra.mxu0 %v600_v59 }
  0xa5   : > { %v400_v60 = vpop.permute.xlu1 %399  ;;  %1045 = vmatprep.mubr.msk.bf16.mxu0 %vm558_vm3, %v545_v27 }
  0xa6   : > { %v572_v61 = vsel %vm558_vm3, %v1283_v36, %v400_v60  ;;  %v441_v62 = vpop.permute.xlu0 %440 }
  0xa7   : > { %v589_v63 = vsel %vm575_vm5, %v572_v61, %v441_v62 }
  0xa9   : > { %v530_v1 = vpop.permute.xlu1 %529 }
  0xaa   : > { %v612_v2 = vsel %vm592_vm6, %v589_v63, %v530_v1  ;;  %v394_v3 = vpop.permute.xlu0 %393 }
  0xab   : > { %802 = vmatmul.mubr.bf16.gmra.mxu1 %v612_v2  ;;  %v566_v7 = vsel %vm558_vm3, %v1291_v45, %v394_v3 }
  0xac   : > { %1049 = vmatprep.mubr.msk.bf16.mxu1 %vm558_vm3, %v557_v28 }
  0xad   : > { %v435_v8 = vpop.permute.xlu1 %434 }
  0xae   : > { %v583_v10 = vsel %vm575_vm5, %v566_v7, %v435_v8  ;;  %v524_v9 = vpop.permute.xlu0 %523 }
  0xaf   : > { %v603_v12 = vsel %vm592_vm6, %v583_v10, %v524_v9 }
  0xb0   : > { %778 = vmatmul.mubr.bf16.gmra.mxu0 %v603_v12 }
  0xb1   : > { %v402_v36 = vpop.permute.xlu1 %401 }
  0xb2   : > { %v574_v16 = vsel %vm558_vm3, %v1323_v21, %v402_v36  ;;  %v443_v13 = vpop.permute.xlu0 %442  ;;  %v1426_v21 = vld [vmem:[%s1482_s2] ss:$0 sm:$0xff] }
  0xb3   : > { %v591_v5 = vsel %vm575_vm5, %v574_v16, %v443_v13 }
  0xb5   : > { %v532_v14 = vpop.permute.xlu1 %531 }
  0xb6   : > { %v615_v15 = vsel %vm592_vm6, %v591_v5, %v532_v14 }
  0xb7   : > { %810 = vmatmul.mubr.bf16.gmra.mxu1 %v615_v15 }
 0x152   : > { %v755_v45 = vpop.f32.mrf.mxu0 }
 0x153   : > { %v825_v0 = vadd.f32 %v1426_v21, %v755_v45 }
 0x154   : > { %v757_v18 = vpop.f32.mrf.mxu0 }
 0x155   : > { %v841_v43 = vmax.f32 %v825_v0, 0.0 }
 0x156   : > { %v758_v19 = vpop.f32.mrf.mxu0 }
 0x157   : > { %v787_v48 = vpop.f32.mrf.mxu1  ;;  %v826_v28 = vadd.f32 %v1426_v21, %v758_v19  ;;  %v859_v54 = vmul.f32 %v1444_v47, %v841_v43 }
 0x158   : > { %v760_v20 = vpop.f32.mrf.mxu0  ;;  %v833_v44 = vadd.f32 %v1426_v21, %v787_v48 }
 0x159   : > { %v789_v17 = vpop.f32.mrf.mxu1  ;;  %v842_v34 = vmax.f32 %v826_v28, 0.0 }
 0x15a   : > { %v763_v23 = vpop.f32.mrf.mxu0  ;;  %v849_v55 = vmax.f32 %v833_v44, 0.0 }
 0x15b   : > { %v790_v22 = vpop.f32.mrf.mxu1  ;;  %v827_v31 = vadd.f32 %v1426_v21, %v763_v23  ;;  %v860_v50 = vmul.f32 %v1436_v40, %v842_v34 }
 0x15c   : > { %v765_v25 = vpop.f32.mrf.mxu0  ;;  %v834_v35 = vadd.f32 %v1426_v21, %v790_v22  ;;  %v867_v8 = vmul.f32 %v1444_v47, %v849_v55 }
 0x15d   : > { %v792_v24 = vpop.f32.mrf.mxu1  ;;  %v843_v41 = vmax.f32 %v827_v31, 0.0  ;;  %v875_v63 = vmax.f32 %v859_v54, %v860_v50 }
 0x15e   : > { %v766_v27 = vpop.f32.mrf.mxu0  ;;  %v850_v51 = vmax.f32 %v834_v35, 0.0 }
 0x15f   : > { %v795_v30 = vpop.f32.mrf.mxu1  ;;  %v828_v58 = vadd.f32 %v1426_v21, %v766_v27  ;;  %v861_v4 = vmul.f32 %v1444_v47, %v843_v41  ;;  %v876_v14 = vrot.slane %v875_v63, 4 }
 0x160   : > { %v768_v26 = vpop.f32.mrf.mxu0  ;;  %v835_v11 = vadd.f32 %v1426_v21, %v795_v30  ;;  %v868_v1 = vmul.f32 %v1436_v40, %v850_v51 }
 0x161   : > { %v797_v29 = vpop.f32.mrf.mxu1  ;;  %v844_v33 = vmax.f32 %v828_v58, 0.0  ;;  %v877_v27 = vmax.f32 %v875_v63, %v876_v14 }
 0x162   : > { %v851_v60 = vmax.f32 %v835_v11, 0.0  ;;  %v903_v15 = vmax.f32 %v867_v8, %v868_v1 }
 0x163   : > { %v798_v32 = vpop.f32.mrf.mxu1  ;;  %v862_v49 = vmul.f32 %v1436_v40, %v844_v33 }
 0x164   : > { %v771_v39 = vpop.f32.mrf.mxu0  ;;  %v836_v42 = vadd.f32 %v1426_v21, %v798_v32  ;;  %v869_v36 = vmul.f32 %v1444_v47, %v851_v60  ;;  %v904_v28 = vrot.slane %v903_v15, 4 }
 0x165   : > { %v800_v37 = vpop.f32.mrf.mxu1  ;;  %v829_v6 = vadd.f32 %v1426_v21, %v771_v39  ;;  %v882_v61 = vmax.f32 %v861_v4, %v862_v49 }
 0x166   : > { %v773_v46 = vpop.f32.mrf.mxu0  ;;  %v852_v53 = vmax.f32 %v836_v42, 0.0  ;;  %v905_v42 = vmax.f32 %v903_v15, %v904_v28 }
 0x167   : > { %v845_v56 = vmax.f32 %v829_v6, 0.0  ;;  %v883_v16 = vrot.slane %v882_v61, 4  ;;  %v878_v6 = vrot.slane %v877_v27, 2 }
 0x168   : > { %v774_v52 = vpop.f32.mrf.mxu0  ;;  %v870_v7 = vmul.f32 %v1436_v40, %v852_v53  ;;  %v906_v55 = vrot.slane %v905_v42, 2 }
 0x169   : > { %v830_v57 = vadd.f32 %v1426_v21, %v774_v52  ;;  %v863_v10 = vmul.f32 %v1444_v47, %v845_v56  ;;  %v884_v24 = vmax.f32 %v882_v61, %v883_v16 }
 0x16a   : > { %v776_v59 = vpop.f32.mrf.mxu0  ;;  %v910_v19 = vmax.f32 %v869_v36, %v870_v7  ;;  %v907_v7 = vmax.f32 %v905_v42, %v906_v55 }
 0x16b   : > { %v803_v38 = vpop.f32.mrf.mxu1  ;;  %v846_v2 = vmax.f32 %v830_v57, 0.0  ;;  %v885_v35 = vrot.slane %v884_v24, 2 }
 0x16c   : > { %v837_v62 = vadd.f32 %v1426_v21, %v803_v38  ;;  %v911_v26 = vrot.slane %v910_v19, 4  ;;  %v879_v38 = vmax.f32 %v877_v27, %v878_v6  ;;  %v908_v14 = vrot.slane %v907_v7, 1 }
 0x16d   : > { %v805_v3 = vpop.f32.mrf.mxu1  ;;  %v864_v9 = vmul.f32 %v1436_v40, %v846_v2  ;;  %v886_v52 = vmax.f32 %v884_v24, %v885_v35 }
 0x16e   : > { %v853_v13 = vmax.f32 %v837_v62, 0.0  ;;  %v912_v46 = vmax.f32 %v910_v19, %v911_v26 }
 0x16f   : > { %v806_v12 = vpop.f32.mrf.mxu1  ;;  %v889_v45 = vmax.f32 %v863_v10, %v864_v9  ;;  %v887_v63 = vrot.slane %v886_v52, 1  ;;  %v880_v10 = vrot.slane %v879_v38, 1 }
 0x170   : > { %v838_v5 = vadd.f32 %v1426_v21, %v806_v12  ;;  %v779_v48 = vpop.f32.mrf.mxu0  ;;  %v871_v25 = vmul.f32 %v1444_v47, %v853_v13  ;;  %v913_v59 = vrot.slane %v912_v46, 2 }
 0x171   : > { %v808_v18 = vpop.f32.mrf.mxu1  ;;  %v831_v20 = vadd.f32 %v1426_v21, %v779_v48  ;;  %v890_v22 = vrot.slane %v889_v45, 4  ;;  %v888_v16 = vmax.f32 %v886_v52, %v887_v63 }
 0x172   : > { %v854_v17 = vmax.f32 %v838_v5, 0.0  ;;  %v781_v23 = vpop.f32.mrf.mxu0  ;;  %v914_v9 = vmax.f32 %v912_v46, %v913_v59 }
 0x173   : > { %v891_v58 = vmax.f32 %v889_v45, %v890_v22  ;;  %v847_v0 = vmax.f32 %v831_v20, 0.0  ;;  %v909_v22 = vmax.f32 %v907_v7, %v908_v14 }
 0x174   : > { %v872_v30 = vmul.f32 %v1436_v40, %v854_v17  ;;  %v782_v29 = vpop.f32.mrf.mxu0  ;;  %v915_v45 = vrot.slane %v914_v9, 1 }
 0x175   : > { %v832_v32 = vadd.f32 %v1426_v21, %v782_v29  ;;  %v892_v43 = vrot.slane %v891_v58, 2  ;;  %v865_v11 = vmul.f32 %v1444_v47, %v847_v0 }
 0x176   : > { %v917_v31 = vmax.f32 %v871_v25, %v872_v30  ;;  %v784_v34 = vpop.f32.mrf.mxu0  ;;  %v916_v24 = vmax.f32 %v914_v9, %v915_v45 }
 0x177   : > { %v811_v33 = vpop.f32.mrf.mxu1  ;;  %v848_v39 = vmax.f32 %v832_v32, 0.0  ;;  %v893_v56 = vmax.f32 %v891_v58, %v892_v43 }
 0x178   : > { %v918_v37 = vrot.slane %v917_v31, 4  ;;  %v839_v41 = vadd.f32 %v1426_v21, %v811_v33 }
 0x179   : > { %v813_v44 = vpop.f32.mrf.mxu1  ;;  %v866_v49 = vmul.f32 %v1436_v40, %v848_v39  ;;  %v894_v8 = vrot.slane %v893_v56, 1 }
 0x17a   : > { %v919_v50 = vmax.f32 %v917_v31, %v918_v37  ;;  %v855_v53 = vmax.f32 %v839_v41, 0.0 }
 0x17b   : > { %v814_v51 = vpop.f32.mrf.mxu1  ;;  %v896_v4 = vmax.f32 %v865_v11, %v866_v49  ;;  %v895_v15 = vmax.f32 %v893_v56, %v894_v8 }
 0x17c   : > { %v840_v54 = vadd.f32 %v1426_v21, %v814_v51  ;;  %v920_v62 = vrot.slane %v919_v50, 2  ;;  %v873_v2 = vmul.f32 %v1444_v47, %v855_v53  ;;  %v881_v47 = vmax.f32 %v879_v38, %v880_v10 }
 0x17d   : > { %v816_v57 = vpop.f32.mrf.mxu1  ;;  %v897_v60 = vrot.slane %v896_v4, 4 }
 0x17e   : > { %v856_v61 = vmax.f32 %v840_v54, 0.0  ;;  %v921_v36 = vmax.f32 %v919_v50, %v920_v62  ;;  %v940_v19 = vsel %vm939_vm7, %v888_v16, %v881_v47 }
 0x17f   : > { %v898_v1 = vmax.f32 %v896_v4, %v897_v60  ;;  %v942_v23 = vsel %vm941_vm8, %v895_v15, %v940_v19 }
 0x180   : > { %v874_v3 = vmul.f32 %v1436_v40, %v856_v61  ;;  %v922_v48 = vrot.slane %v921_v36, 1 }
 0x181   : > { %v899_v21 = vrot.slane %v898_v1, 2 }
 0x182   : > { %v924_v12 = vmax.f32 %v873_v2, %v874_v3  ;;  %v923_v27 = vmax.f32 %v921_v36, %v922_v48 }
 0x183   : > { %v900_v13 = vmax.f32 %v898_v1, %v899_v21 }
 0x184   : > { %v925_v5 = vrot.slane %v924_v12, 4 }
 0x185   : > { %v901_v40 = vrot.slane %v900_v13, 1 }
 0x186   : > { %v926_v18 = vmax.f32 %v924_v12, %v925_v5 }
 0x187   : > { %v902_v17 = vmax.f32 %v900_v13, %v901_v40 }
 0x188   : > { %v927_v20 = vrot.slane %v926_v18, 2 }
 0x189   : > { %v944_v25 = vsel %vm943_vm9, %v902_v17, %v942_v23 }
 0x18a   : > { %v928_v30 = vmax.f32 %v926_v18, %v927_v20  ;;  %v946_v28 = vsel %vm945_vm10, %v909_v22, %v944_v25 }
 0x18b   : > { %v948_v29 = vsel %vm947_vm11, %v916_v24, %v946_v28 }
 0x18c   : > { %v929_v58 = vrot.slane %v928_v30, 1  ;;  %v950_v26 = vsel %vm949_vm12, %v923_v27, %v948_v29 }
 0x18e   : > { %v930_v31 = vmax.f32 %v928_v30, %v929_v58 }
 0x190   : > { %v952_v0 = vsel %vm951_vm13, %v930_v31, %v950_v26 }
 0x191   : > { %954 = vst [vmem:[%s200_s30] sm:$0xff] %v952_v0 }
 0x192 PF: > { %s14_s15 = sadd.s32 1, %s1118_s15  }
 0x193   : > { %p11_p5 = scmp.ge.s32.totalorder %s14_s15, 5  }
 0x195   :  { %13 = sbr.rel (!%p11_p5) target bundleno = 1 (0x1), region = 66 }

// kernel: cl4ljp_forward.8
= control target key start
LH: loop header
LB: loop body
LE: loop exit
PB: predicated region body
PF: predicated region fallthrough
CT: control target
= control target key end

     0   :  { %vm118_vm0 = vcmask 1045504   ;;  %v386_v5 = vmov 0.0   ;;  %vm387_vm1 = vmmov 0   ;;  %v164_v29 = vlaneseq  ;;  %s516_s1 = inlined_call_operand.vmem [shape: f32[8,128], index: 1, kind: input, shape index: {}, may-alias: {0,1}]   ;;  %s517_s0 = inlined_call_operand.vmem [shape: f32[8,128], index: 0, kind: input, shape index: {}, may-alias: {0,1}]   ;;  %s518_s2 = inlined_call_operand.vmem [shape: f32[8,6,128], index: 2, kind: input, shape index: {}]   ;;  %s519_s4 = inlined_call_operand.vmem [shape: f32[8,6], index: 4, kind: output, shape index: {1}]   ;;  %s520_s3 = inlined_call_operand.vmem [shape: f32[8,8], index: 3, kind: output, shape index: {0}]  }
   0x1   :  { %v17_v0 = vld [vmem:[%s516_s1] sm:$0xff]  ;;  %358 = vmatprep.subr.mxu0 %v386_v5  ;;  %v428_v6 = vld [vmem:[%s518_s2 + $0x8] sm:$0x3f]  ;;  %v439_v11 = vld [vmem:[%s518_s2 + $0x10] sm:$0x3f]  ;;  %360 = vmatprep.mubr.msk.f32.mxu0 %vm387_vm1, %v386_v5  ;;  %vm331_vm2 = vcmask 1041409  }
   0x2   :  { %v16_v1 = vld [vmem:[%s517_s0] sm:$0xff]  ;;  %v32_v2 = vmul.f32 %v17_v0, %v17_v0  ;;  %v111_v8 = vmul.f32 %v428_v6, %v428_v6  ;;  %v112_v12 = vmul.f32 %v439_v11, %v439_v11  ;;  %v446_v13 = vld [vmem:[%s518_s2 + $0x18] sm:$0x3f]  ;;  %v462_v19 = vld [vmem:[%s518_s2 + $0x28] sm:$0x3f]  ;;  %v165_v30 = vshrl.u32 %v164_v29, 7 }
   0x3   :  { %v26_v3 = vmul.f32 %v16_v1, %v16_v1  ;;  %v423_v4 = vld [vmem:[%s518_s2] sm:$0x3f]  ;;  %v113_v15 = vmul.f32 %v446_v13, %v446_v13  ;;  %v115_v21 = vmul.f32 %v462_v19, %v462_v19  ;;  %v470_v22 = vld [vmem:[%s518_s2 + $0x30] sm:$0x3f]  ;;  %v475_v23 = vld [vmem:[%s518_s2 + $0x38] sm:$0x3f] }
   0x4   :  { %33 = vadd.xlane.f32.xlu0 %v32_v2  ;;  %v110_v7 = vmul.f32 %v423_v4, %v423_v4  ;;  %v122_v10 = vsel %vm118_vm0, %v111_v8, 0.0  ;;  %v125_v14 = vsel %vm118_vm0, %v112_v12, 0.0  ;;  %v454_v16 = vld [vmem:[%s518_s2 + $0x20] sm:$0x3f]  ;;  %v116_v24 = vmul.f32 %v470_v22, %v470_v22 }
   0x5   :  { %v128_v17 = vsel %vm118_vm0, %v113_v15, 0.0  ;;  %v114_v18 = vmul.f32 %v454_v16, %v454_v16  ;;  %v117_v25 = vmul.f32 %v475_v23, %v475_v23  ;;  %v134_v26 = vsel %vm118_vm0, %v115_v21, 0.0 }
   0x6   :  { %v119_v9 = vsel %vm118_vm0, %v110_v7, 0.0  ;;  %v137_v27 = vsel %vm118_vm0, %v116_v24, 0.0  ;;  %v298_v31 = vand.u32 127, %v164_v29  ;;  %v388_v37 = vmov 1966171168  }
   0x7   :  { %120 = vadd.xlane.f32.xlu1 %v119_v9  ;;  %v131_v20 = vsel %vm118_vm0, %v114_v18, 0.0  ;;  %v140_v28 = vsel %vm118_vm0, %v117_v25, 0.0  ;;  %v162_v38 = vunpack.c.l.s4 %v388_v37  ;;  %v211_v47 = vsub.s32 0, %v165_v30 }
   0x8   :  { %27 = vadd.xlane.f32.xlu0 %v26_v3  ;;  %v484_v32 = vsub.s32 %v298_v31, %v165_v30  ;;  %vm333_vm3 = vcmask 1042434   ;;  %vm335_vm4 = vcmask 1043459   ;;  %vm337_vm5 = vcmask 1044484  }
   0x9   :  { %v163_v39 = vunpack.c.0.s8 %v162_v38  ;;  %vm339_vm6 = vcmask 1045509   ;;  %vm341_vm7 = vcmask 1046534   ;;  %vm343_vm8 = vcmask 1047559  }
   0xa   :  { %vm346_vm9 = vcmask 48128   ;;  %vm108_vm10 = vcmask 64512  }
   0xb   :  { %123 = vadd.xlane.f32.xlu1 %v122_v10  ;;  %v166_v42 = vsub.s32 %v163_v39, %v165_v30 }
   0xc   :  { %126 = vadd.xlane.f32.xlu0 %v125_v14 }
   0xf   :  { %129 = vadd.xlane.f32.xlu1 %v128_v17 }
  0x10   :  { %132 = vadd.xlane.f32.xlu0 %v131_v20 }
  0x13   :  { %135 = vadd.xlane.f32.xlu1 %v134_v26 }
  0x14   :  { %138 = vadd.xlane.f32.xlu0 %v137_v27 }
  0x17   :  { %141 = vadd.xlane.f32.xlu1 %v140_v28 }
  0x8d   :  { %v34_v33 = vpop.xlane.xlu0 %33 }
  0x8e   :  { %v35_v34 = vmax.f32 %v34_v33, 1e-16 }
  0x90   :  { %366 = vrsqrt.f32 %v35_v34  ;;  %v121_v20 = vpop.xlane.xlu1 %120 }
  0x91   :  { %v28_v35 = vpop.xlane.xlu0 %27  ;;  %v143_v25 = vmax.f32 %v121_v20, 1e-16 }
  0x92   :  { %v29_v36 = vmax.f32 %v28_v35, 1e-16 }
  0x94   :  { %368 = vrsqrt.f32 %v29_v36 }
  0x95   :  { %v127_v21 = vpop.xlane.xlu0 %126  ;;  %370 = vrsqrt.f32 %v143_v25 }
  0x99   :  { %v133_v27 = vpop.xlane.xlu0 %132 }
  0x9d   :  { %v367_v40 = vpop.eup %366  ;;  %v139_v30 = vpop.xlane.xlu0 %138 }
  0x9e   :  { %v37_v41 = vmul.f32 %v367_v40, %v17_v0  ;;  %v149_v34 = vmax.f32 %v139_v30, 1e-16 }
  0xa0   :  { %359 = vmatpush3.xpose.msra.mxu0 %v37_v41 }
  0xa1   :  { %v369_v43 = vpop.eup %368 }
  0xa2   :  { %v31_v44 = vmul.f32 %v369_v43, %v16_v1  ;;  %v371_v36 = vpop.eup %370 }
  0xa4   :  { %361 = vmatmul.mubr.f32.vlgmr.msra.gmra.mxu0 %v31_v44  ;;  %v160_v45 = vcombine.high %v31_v44, %v31_v44  ;;  %v167_v46 = vrot.slane %v31_v44, %v166_v42 }
  0xa6   :  { %v183_v48 = vrot.slane %v167_v46, %v166_v42  ;;  %v175_v49 = vcombine.high %v167_v46, %v167_v46  ;;  %v174_v50 = vrot.slane %v160_v45, %v166_v42 }
  0xa8   :  { %v212_v51 = vrot.slane %v183_v48, %v211_v47  ;;  %v197_v52 = vrot.slane %v175_v49, %v166_v42  ;;  %v205_v53 = vcombine.high %v183_v48, %v183_v48  ;;  %v190_v54 = vrot.slane %v174_v50, %v166_v42 }
  0xa9   :  { %v176_v55 = vcombine.high %v174_v50, %v174_v50 }
  0xaa   :  { %v249_v56 = vmul.f32 %v212_v51, %v423_v4  ;;  %v216_v57 = vrot.slane %v197_v52, %v211_v47  ;;  %v220_v58 = vrot.slane %v205_v53, %v211_v47  ;;  %v207_v59 = vcombine.high %v197_v52, %v197_v52 }
  0xab   :  { %v228_v60 = vrot.slane %v190_v54, %v211_v47  ;;  %v204_v61 = vrot.slane %v176_v55, %v166_v42  ;;  %v206_v62 = vcombine.high %v190_v54, %v190_v54 }
  0xac   :  { %v257_v63 = vsel %vm118_vm0, %v249_v56, 0.0  ;;  %v250_v0 = vmul.f32 %v216_v57, %v428_v6  ;;  %v251_v1 = vmul.f32 %v220_v58, %v439_v11  ;;  %v224_v2 = vrot.slane %v207_v59, %v211_v47 }
  0xad   :  { %258 = vadd.xlane.f32.xlu0 %v257_v63  ;;  %v232_v7 = vrot.slane %v204_v61, %v211_v47  ;;  %v208_v4 = vcombine.high %v204_v61, %v204_v61  ;;  %v253_v9 = vmul.f32 %v228_v60, %v454_v16  ;;  %v236_v10 = vrot.slane %v206_v62, %v211_v47 }
  0xae   :  { %v260_v3 = vsel %vm118_vm0, %v250_v0, 0.0  ;;  %v252_v5 = vmul.f32 %v224_v2, %v446_v13  ;;  %v263_v8 = vsel %vm118_vm0, %v251_v1, 0.0 }
  0xaf   :  { %261 = vadd.xlane.f32.xlu1 %v260_v3  ;;  %v254_v6 = vmul.f32 %v232_v7, %v462_v19  ;;  %v240_v11 = vrot.slane %v208_v4, %v211_v47  ;;  %v269_v14 = vsel %vm118_vm0, %v253_v9, 0.0  ;;  %v255_v15 = vmul.f32 %v236_v10, %v470_v22  ;;  %v124_v19 = vpop.xlane.xlu1 %123 }
  0xb0   :  { %v266_v12 = vsel %vm118_vm0, %v252_v5, 0.0  ;;  %v144_v26 = vmax.f32 %v124_v19, 1e-16  ;;  %v145_v22 = vmax.f32 %v127_v21, 1e-16 }
  0xb1   :  { %264 = vadd.xlane.f32.xlu0 %v263_v8  ;;  %v272_v13 = vsel %vm118_vm0, %v254_v6, 0.0  ;;  %v256_v17 = vmul.f32 %v240_v11, %v475_v23  ;;  %v275_v16 = vsel %vm118_vm0, %v255_v15, 0.0  ;;  %v147_v23 = vmax.f32 %v133_v27, 1e-16 }
  0xb2   :  { %372 = vrsqrt.f32 %v144_v26 }
  0xb3   :  { %267 = vadd.xlane.f32.xlu1 %v266_v12  ;;  %v278_v18 = vsel %vm118_vm0, %v256_v17, 0.0  ;;  %v130_v24 = vpop.xlane.xlu1 %129  ;;  %374 = vrsqrt.f32 %v145_v22 }
  0xb4   :  { %v146_v29 = vmax.f32 %v130_v24, 1e-16 }
  0xb5   :  { %270 = vadd.xlane.f32.xlu0 %v269_v14 }
  0xb6   :  { %376 = vrsqrt.f32 %v146_v29 }
  0xb7   :  { %273 = vadd.xlane.f32.xlu1 %v272_v13  ;;  %v136_v28 = vpop.xlane.xlu1 %135  ;;  %378 = vrsqrt.f32 %v147_v23 }
  0xb8   :  { %v148_v31 = vmax.f32 %v136_v28, 1e-16 }
  0xb9   :  { %276 = vadd.xlane.f32.xlu0 %v275_v16 }
  0xba   :  { %380 = vrsqrt.f32 %v148_v31 }
  0xbb   :  { %279 = vadd.xlane.f32.xlu1 %v278_v18  ;;  %v142_v33 = vpop.xlane.xlu1 %141  ;;  %382 = vrsqrt.f32 %v149_v34 }
  0xbc   :  { %v150_v35 = vmax.f32 %v142_v33, 1e-16 }
  0xbe   :  { %384 = vrsqrt.f32 %v150_v35 }
  0xbf   :  { %v373_v37 = vpop.eup %372 }
  0xc0   :  { %v375_v40 = vpop.eup %374 }
  0xc3   :  { %v377_v43 = vpop.eup %376 }
  0xc4   :  { %v379_v48 = vpop.eup %378 }
  0xc7   :  { %v381_v53 = vpop.eup %380 }
  0xc8   :  { %v383_v58 = vpop.eup %382 }
  0xcb   :  { %v385_v63 = vpop.eup %384 }
 0x136   :  { %v259_v38 = vpop.xlane.xlu0 %258 }
 0x137   :  { %v281_v39 = vmul.f32 %v371_v36, %v259_v38 }
 0x138   :  { %v262_v41 = vpop.xlane.xlu1 %261 }
 0x139   :  { %v282_v42 = vmul.f32 %v373_v37, %v262_v41  ;;  %v302_v45 = vrot.slane %v281_v39, %v484_v32 }
 0x13a   :  { %v265_v44 = vpop.xlane.xlu0 %264 }
 0x13b   :  { %v306_v46 = vrot.slane %v282_v42, %v484_v32  ;;  %v283_v47 = vmul.f32 %v375_v40, %v265_v44 }
 0x13c   :  { %v268_v49 = vpop.xlane.xlu1 %267 }
 0x13d   :  { %v332_v50 = vsel %vm331_vm2, %v306_v46, %v302_v45  ;;  %v310_v51 = vrot.slane %v283_v47, %v484_v32  ;;  %v284_v52 = vmul.f32 %v377_v43, %v268_v49 }
 0x13e   :  { %v271_v54 = vpop.xlane.xlu0 %270 }
 0x13f   :  { %v334_v55 = vsel %vm333_vm3, %v310_v51, %v332_v50  ;;  %v314_v56 = vrot.slane %v284_v52, %v484_v32  ;;  %v285_v57 = vmul.f32 %v379_v48, %v271_v54 }
 0x140   :  { %v274_v59 = vpop.xlane.xlu1 %273 }
 0x141   :  { %v336_v60 = vsel %vm335_vm4, %v314_v56, %v334_v55  ;;  %v318_v61 = vrot.slane %v285_v57, %v484_v32  ;;  %v286_v62 = vmul.f32 %v381_v53, %v274_v59 }
 0x142   :  { %v277_v0 = vpop.xlane.xlu0 %276 }
 0x143   :  { %v338_v1 = vsel %vm337_vm5, %v318_v61, %v336_v60  ;;  %v322_v2 = vrot.slane %v286_v62, %v484_v32  ;;  %v287_v3 = vmul.f32 %v383_v58, %v277_v0 }
 0x144   :  { %v280_v5 = vpop.xlane.xlu1 %279 }
 0x145   :  { %v340_v7 = vsel %vm339_vm6, %v322_v2, %v338_v1  ;;  %v326_v4 = vrot.slane %v287_v3, %v484_v32  ;;  %v288_v8 = vmul.f32 %v385_v63, %v280_v5 }
 0x147   :  { %v342_v9 = vsel %vm341_vm7, %v326_v4, %v340_v7  ;;  %v330_v10 = vrot.slane %v288_v8, %v484_v32 }
 0x149   :  { %v344_v12 = vsel %vm343_vm8, %v330_v10, %v342_v9 }
 0x14a   :  { %347 = vst.msk [vmem:[%s519_s4] sm:$0xff] %vm346_vm9, %v344_v12 }
 0x164   :  { %v104_v6 = vpop.f32.mrf.mxu0 }
 0x165   :  { %109 = vst.msk [vmem:[%s520_s3] sm:$0xff] %vm108_vm10, %v104_v6 }
 0x166   :  { %v362_v11 = vpop.f32.mrf.mxu0 }

// kernel: cl4ljp_forward.9
= control target key start
LH: loop header
LB: loop body
LE: loop exit
PB: predicated region body
PF: predicated region fallthrough
CT: control target
= control target key end

     0   :  { %s748_s18 = smov 0   ;;  %s784_s0 = inlined_call_operand.vmem [shape: bf16[8,256], index: 0, kind: input, shape index: {}]   ;;  %s785_s1 = inlined_call_operand.vmem [shape: bf16[3,256,32], index: 1, kind: input, shape index: {}]   ;;  %s786_s2 = inlined_call_operand.vmem [shape: f32[3,1,32], index: 2, kind: input, shape index: {}]   ;;  %s787_s3 = inlined_call_operand.vmem [shape: bf16[3,32,128], index: 3, kind: input, shape index: {}]   ;;  %s788_s4 = inlined_call_operand.vmem [shape: f32[3,1,128], index: 4, kind: input, shape index: {}]   ;;  %s789_s5 = inlined_call_operand.vmem [shape: f32[3,8,128], index: 5, kind: output, shape index: {}]  }
   0x1 LB: > { %s608_s19 = sadd.s32 4294967295, %s714_s18   ;;  %p612_p0 = scmp.ge.s32.totalorder %s714_s18, 1  ;;  %s714_s18 = sphi %s748_s18, %s15_s18  }
   0x2   : > { %p213_p1 = scmp.lt.s32.totalorder %s714_s18, 4 }
   0x4   : > { %p214_p2 = pnand %p612_p0, %p213_p1 }
   0x5   : > { %p251_p3 = scmp.lt.s32.totalorder (!%p214_p2), %s608_s19, 2 }
   0x6   : > { %217 = sbr.rel (%p214_p2) target bundleno = 449 (0x1c1), region = 40 }
   0xb   : > { %v272_v0 = vld [vmem:[%s784_s0] sm:$0xff]  ;;  %s791_s19 = smov (!%p251_p3, %s608_s19), 2  ;;  %v716_v20 = vmov 0.0   ;;  %vm717_vm0 = vmmov 0   ;;  %vm480_vm1 = vcmask 261120  }
   0xc   : > { %v620_v1 = vcombine.high %v272_v0, %v272_v0  ;;  %s643_s22 = sshll.u32 %s791_s19, 7  ;;  %v619_v18 = vcombine.low %v272_v0, %v272_v0  ;;  %s644_s26 = sshll.u32 %s791_s19, 4  ;;  %670 = vmatprep.subr.bf16.mxu1 %v716_v20  ;;  %674 = vmatprep.mubr.msk.bf16.mxu1 %vm717_vm0, %v716_v20 }
   0xd   : > { %s255_s25 = scalar_lea.vmem %s785_s1, %s643_s22  ;;  %s263_s29 = scalar_lea.vmem %s787_s3, %s644_s26 }
   0xe   : > { %447 = vmatprep.mubr.bf16.mxu0 %v620_v1  ;;  %v688_v2 = vld [vmem:[%s255_s25 + $0x78] sm:$0xff]   ;;  %v690_v4 = vld [vmem:[%s255_s25 + $0x70] sm:$0xff]   ;;  %v692_v6 = vld [vmem:[%s255_s25 + $0x68] sm:$0xff]   ;;  %s258_s7 = scalar_lea.vmem %s786_s2, %s791_s19  ;;  %s266_s10 = scalar_lea.vmem %s788_s4, %s791_s19 }
   0xf   : > { %v689_v3 = vld [vmem:[%s255_s25 + $0x38] sm:$0xff]   ;;  %645 = vmatprep.subr.bf16.mxu0 %v688_v2  ;;  %v691_v5 = vld [vmem:[%s255_s25 + $0x30] sm:$0xff]   ;;  %v693_v7 = vld [vmem:[%s255_s25 + $0x28] sm:$0xff]   ;;  %s617_s11 = sshll.u32 %s791_s19, 3 }
  0x10   : > { %646 = vmatpush3.bf16.msra.mxu0 %v689_v3  ;;  %v694_v8 = vld [vmem:[%s255_s25 + $0x60] sm:$0xff]   ;;  %v696_v10 = vld [vmem:[%s255_s25 + $0x58] sm:$0xff]   ;;  %v698_v12 = vld [vmem:[%s255_s25 + $0x50] sm:$0xff]   ;;  %s270_s14 = scalar_lea.vmem %s789_s5, %s617_s11 }
  0x11   : > { %647 = vmatprep.subr.bf16.mxu0 %v690_v4  ;;  %v695_v9 = vld [vmem:[%s255_s25 + $0x20] sm:$0xff]   ;;  %v697_v11 = vld [vmem:[%s255_s25 + $0x18] sm:$0xff]   ;;  %v699_v13 = vld [vmem:[%s255_s25 + $0x10] sm:$0xff]  }
  0x12   : > { %v700_v14 = vld [vmem:[%s255_s25 + $0x48] sm:$0xff]   ;;  %v702_v16 = vld [vmem:[%s255_s25 + $0x40] sm:$0xff]  }
  0x13   : > { %v701_v15 = vld [vmem:[%s255_s25 + $0x8] sm:$0xff]   ;;  %v703_v17 = vld [vmem:[%s255_s25] sm:$0xff]  }
  0x14   : > { %648 = vmatpush3.bf16.msra.mxu0 %v691_v5  ;;  %v706_v19 = vld [vmem:[%s263_s29 + $0x8] sm:$0xff]   ;;  %v707_v21 = vld [vmem:[%s263_s29] sm:$0xff]  }
  0x15   : > { %649 = vmatprep.subr.bf16.mxu0 %v692_v6  ;;  %671 = vmatpush3.bf16.msra.mxu1 %v706_v19  ;;  %v618_v23 = vld [vmem:[%s258_s7] ss:$0 sm:$0xff] }
  0x16   : > { %672 = vmatprep.subr.bf16.mxu1 %v716_v20  ;;  %v637_v31 = vld [vmem:[%s266_s10] ss:$0 sm:$0xff] }
  0x18   : > { %650 = vmatpush3.bf16.msra.mxu0 %v693_v7 }
  0x19   : > { %651 = vmatprep.subr.bf16.mxu0 %v694_v8  ;;  %673 = vmatpush3.bf16.msra.mxu1 %v707_v21 }
  0x1c   : > { %652 = vmatpush3.bf16.msra.mxu0 %v695_v9 }
  0x1d   : > { %653 = vmatprep.subr.bf16.mxu0 %v696_v10 }
  0x20   : > { %654 = vmatpush3.bf16.msra.mxu0 %v697_v11 }
  0x21   : > { %655 = vmatprep.subr.bf16.mxu0 %v698_v12 }
  0x24   : > { %656 = vmatpush3.bf16.msra.mxu0 %v699_v13 }
  0x25   : > { %657 = vmatprep.subr.bf16.mxu0 %v700_v14 }
  0x28   : > { %658 = vmatpush3.bf16.msra.mxu0 %v701_v15 }
  0x29   : > { %659 = vmatprep.subr.bf16.mxu0 %v702_v16 }
  0x2c   : > { %660 = vmatpush3.bf16.msra.mxu0 %v703_v17 }
  0x2f   : > { %448 = vmatmul.mubr.bf16.vlgmr.msra.gmra.mxu0 %v619_v18 }
  0xef   : > { %v661_v22 = vpop.f32.mrf.mxu0 }
  0xf1   : > { %v662_v24 = vpop.f32.mrf.mxu0 }
  0xf2   : > { %v663_v25 = vadd.f32 %v662_v24, %v661_v22 }
  0xf3   : > { %v664_v26 = vpop.f32.mrf.mxu0 }
  0xf4   : > { %v450_v27 = vadd.f32 %v663_v25, %v618_v23 }
  0xf5   : > { %v665_v28 = vpop.f32.mrf.mxu0 }
  0xf6   : > { %v455_v29 = vmax.f32 %v450_v27, 0.0 }
  0xf8   : > { %v456_v30 = vpack.c.bf16 %v455_v29, %v455_v29 }
  0xfa   : > { %675 = vmatmul.mubr.msk.bf16.vlgmr.msra.gmra.mxu1 %vm480_vm1, %v456_v30 }
 0x1ba   : > { %v518_v32 = vpop.f32.mrf.mxu1 }
 0x1bb   : > { %v519_v33 = vadd.f32 %v637_v31, %v518_v32 }
 0x1bc   : > { %v676_v34 = vpop.f32.mrf.mxu1 }
 0x1bd   : > { %524 = vst [vmem:[%s270_s14] sm:$0xff] %v519_v33 }
 0x1be   : > { %v521_v35 = vpop.f32.mrf.mxu1 }
 0x1c0   : > { %v677_v36 = vpop.f32.mrf.mxu1 }
 0x1c1 PF: > { %s15_s18 = sadd.s32 1, %s714_s18  }
 0x1c2   : > { %p12_p4 = scmp.ge.s32.totalorder %s15_s18, 5  }
 0x1c4   :  { %14 = sbr.rel (!%p12_p4) target bundleno = 1 (0x1), region = 79 }

</bundles_post_ra>
